<compile_context>
chip_gen: v7x
topology: tpu7x:2x2x1
jax: 0.10.0
libtpu: 0.0.40
codegen_flags: <defaults>
</compile_context>

<pallas_src>
import math
import functools

import jax
import jax.numpy as jnp
from jax.experimental import pallas as pl
from jax.experimental.pallas import tpu as pltpu


def _layer_norm(x, gamma, beta, eps=1e-5):
    # LayerNorm over the last dim, PyTorch semantics (biased variance, eps=1e-5).
    mu = jnp.mean(x, axis=-1, keepdims=True)
    xc = x - mu
    var = jnp.mean(xc * xc, axis=-1, keepdims=True)
    inv = jax.lax.rsqrt(var + eps)
    return xc * inv * gamma + beta


def encoder_block_kernel(
    xq_ref, xf_ref, mask_ref,
    wq_ref, bq_ref, wkv_ref, bkv_ref, wo_ref, bo_ref,
    g1_ref, be1_ref,
    w1_ref, b1_ref, w2_ref, b2_ref,
    g2_ref, be2_ref,
    o_ref,
    *, num_heads: int,
):
    f32 = jnp.float32
    bf16 = jnp.bfloat16

    xq = xq_ref[0]          # (TQ, D) f32 — query rows of this tile (+ residual)
    xf = xf_ref[0]          # (S,  D) f32 — full sequence, source of K/V
    mask = mask_ref[0]      # (TQ, S) f32 — 1.0 = attend

    TQ, D = xq.shape
    Dh = D // num_heads
    scale = jnp.float32(1.0 / math.sqrt(Dh))

    # Additive attention bias, computed ONCE per tile (0 keep / -1e9 masked).
    bias = (mask - 1.0) * jnp.float32(1e9)                      # (TQ, S)

    # --- projections: bf16 operands, f32 accumulation --------------------
    xq_b = xq.astype(bf16)
    xf_b = xf.astype(bf16)

    q = jnp.dot(xq_b, wq_ref[...], preferred_element_type=f32) + bq_ref[...]
    q = q * scale                                               # fold scale once
    kv = jnp.dot(xf_b, wkv_ref[...], preferred_element_type=f32) + bkv_ref[...]
    k = kv[:, :D]
    v = kv[:, D:]

    q_b = q.astype(bf16)
    k_b = k.astype(bf16)
    v_b = v.astype(bf16)
    wo = wo_ref[...]                                            # (D, D) bf16

    # --- per-head attention, output projection folded into the loop ------
    attn = jnp.zeros((TQ, D), f32)
    for h in range(num_heads):                                  # static unroll
        lo, hi = h * Dh, (h + 1) * Dh
        qh = q_b[:, lo:hi]                                      # (TQ, Dh)
        kh = k_b[:, lo:hi]                                      # (S,  Dh)
        vh = v_b[:, lo:hi]                                      # (S,  Dh)
        s = jnp.dot(qh, kh.T, preferred_element_type=f32) + bias  # (TQ, S)
        s = s - jnp.max(s, axis=-1, keepdims=True)
        p = jnp.exp(s)
        p = p * pl.reciprocal(jnp.sum(p, axis=-1, keepdims=True), approx=True)
        ctx = jnp.dot(p.astype(bf16), vh, preferred_element_type=f32)  # (TQ, Dh)
        attn = attn + jnp.dot(ctx.astype(bf16), wo[lo:hi, :],
                              preferred_element_type=f32)
    attn = attn + bo_ref[...]                                   # single broadcast

    # --- residual + LayerNorm 1 (f32) ------------------------------------
    h1 = _layer_norm(attn + xq, g1_ref[...], be1_ref[...])

    # --- feed-forward: Linear -> ReLU -> Linear (bf16 matmuls, f32 acc) ---
    ff = jnp.dot(h1.astype(bf16), w1_ref[...], preferred_element_type=f32)
    ff = jnp.maximum(ff + b1_ref[...], 0.0)
    ff = jnp.dot(ff.astype(bf16), w2_ref[...], preferred_element_type=f32)
    ff = ff + b2_ref[...]

    # --- residual + LayerNorm 2 (f32) ------------------------------------
    out = _layer_norm(ff + h1, g2_ref[...], be2_ref[...])
    o_ref[0] = out.astype(o_ref.dtype)


def encoder_block(x, mask, params, *, num_heads: int, tq: int | None = None):
    B, S, D = x.shape
    Dff = params["w1"].shape[1]
    assert D % num_heads == 0

    if tq is None:
        tq = S if S <= 512 else 256     # query-row tile
    assert S % tq == 0, "tq must divide S"

    bf16 = jnp.bfloat16
    # Weights go to bf16 (halves HBM/VMEM; native MXU rate). Biases/LN stay f32.
    wq = params["wq"].astype(bf16)
    wkv = jnp.concatenate([params["wk"], params["wv"]], axis=1).astype(bf16)
    bkv = jnp.concatenate([params["bk"], params["bv"]], axis=1)
    wo = params["wo"].astype(bf16)
    w1 = params["w1"].astype(bf16)
    w2 = params["w2"].astype(bf16)

    def full(shape):
        return pl.BlockSpec(shape, lambda b, qi: (0,) * len(shape))

    in_specs = [
        pl.BlockSpec((1, tq, D), lambda b, qi: (b, qi, 0)),   # x  (query tile)
        pl.BlockSpec((1, S, D), lambda b, qi: (b, 0, 0)),     # x  (full, K/V)
        pl.BlockSpec((1, tq, S), lambda b, qi: (b, qi, 0)),   # mask tile
        full((D, D)), full((1, D)),                           # wq, bq
        full((D, 2 * D)), full((1, 2 * D)),                   # wkv, bkv
        full((D, D)), full((1, D)),                           # wo, bo
        full((1, D)), full((1, D)),                           # ln1 gamma, beta
        full((D, Dff)), full((1, Dff)),                       # w1, b1
        full((Dff, D)), full((1, D)),                         # w2, b2
        full((1, D)), full((1, D)),                           # ln2 gamma, beta
    ]

    kernel = functools.partial(encoder_block_kernel, num_heads=num_heads)

    return pl.pallas_call(
        kernel,
        out_shape=jax.ShapeDtypeStruct((B, S, D), x.dtype),
        grid=(B, S // tq),
        in_specs=in_specs,
        out_specs=pl.BlockSpec((1, tq, D), lambda b, qi: (b, qi, 0)),
        compiler_params=pltpu.CompilerParams(
            dimension_semantics=("parallel", "parallel"),
            vmem_limit_bytes=64 * 1024 * 1024,
        ),
    )(
        x, x, mask,
        wq, params["bq"], wkv, bkv, wo, params["bo"],
        params["ln1_g"], params["ln1_b"],
        w1, params["b1"], w2, params["b2"],
        params["ln2_g"], params["ln2_b"],
    )


def encoder_block_ref(x, mask, params, *, num_heads: int, matmul_dtype=None):
    """Pure-JAX reference. matmul_dtype=None -> exact PyTorch f32 semantics;
    matmul_dtype=bf16 emulates the kernel's bf16-operand / f32-acc matmuls."""
    B, S, D = x.shape
    Dh = D // num_heads
    scale = 1.0 / math.sqrt(Dh)
    cast = (lambda a: a.astype(matmul_dtype)) if matmul_dtype is not None else (lambda a: a)

    def proj(a, w, b):
        return jnp.dot(cast(a), cast(w), preferred_element_type=jnp.float32) + b

    def heads(t):
        return t.reshape(B, S, num_heads, Dh).transpose(0, 2, 1, 3)

    q = heads(proj(x, params["wq"], params["bq"])) * scale
    k = heads(proj(x, params["wk"], params["bk"]))
    v = heads(proj(x, params["wv"], params["bv"]))
    s = jnp.einsum("bhqd,bhkd->bhqk", cast(q), cast(k),
                   preferred_element_type=jnp.float32)
    s = jnp.where(mask[:, None, :, :] == 0.0, -1e9, s)
    p = jax.nn.softmax(s, axis=-1)
    ctx = jnp.einsum("bhqk,bhkd->bhqd", cast(p), cast(v),
                     preferred_element_type=jnp.float32)
    ctx = ctx.transpose(0, 2, 1, 3).reshape(B, S, D)
    attn = proj(ctx, params["wo"], params["bo"])

    def ln(t, g, b, eps=1e-5):
        mu = jnp.mean(t, axis=-1, keepdims=True)
        var = jnp.mean((t - mu) ** 2, axis=-1, keepdims=True)
        return (t - mu) / jnp.sqrt(var + eps) * g + b

    h1 = ln(attn + x, params["ln1_g"], params["ln1_b"])
    ff = jnp.maximum(proj(h1, params["w1"], params["b1"]), 0.0)
    ff = proj(ff, params["w2"], params["b2"])
    return ln(ff + h1, params["ln2_g"], params["ln2_b"])


def make_params(key, d_model, d_ff):
    ks = jax.random.split(key, 12)
    std = 0.02
    return {
        "wq": jax.random.normal(ks[0], (d_model, d_model), jnp.float32) * std,
        "bq": jax.random.normal(ks[1], (1, d_model), jnp.float32) * std,
        "wk": jax.random.normal(ks[2], (d_model, d_model), jnp.float32) * std,
        "bk": jax.random.normal(ks[3], (1, d_model), jnp.float32) * std,
        "wv": jax.random.normal(ks[4], (d_model, d_model), jnp.float32) * std,
        "bv": jax.random.normal(ks[5], (1, d_model), jnp.float32) * std,
        "wo": jax.random.normal(ks[6], (d_model, d_model), jnp.float32) * std,
        "bo": jax.random.normal(ks[7], (1, d_model), jnp.float32) * std,
        "ln1_g": jnp.ones((1, d_model), jnp.float32),
        "ln1_b": jnp.zeros((1, d_model), jnp.float32),
        "w1": jax.random.normal(ks[8], (d_model, d_ff), jnp.float32) * std,
        "b1": jax.random.normal(ks[9], (1, d_ff), jnp.float32) * std,
        "w2": jax.random.normal(ks[10], (d_ff, d_model), jnp.float32) * std,
        "b2": jax.random.normal(ks[11], (1, d_model), jnp.float32) * std,
        "ln2_g": jnp.ones((1, d_model), jnp.float32),
        "ln2_b": jnp.zeros((1, d_model), jnp.float32),
    }


if __name__ == "__main__":
    B, S, D, H = 2, 8, 32, 4       # small shapes; d_model=32, num_heads=4
    Dff = 4 * D                    # FeedForwardBlock hidden dim = 4 * d_model

    key = jax.random.PRNGKey(0)
    kx, kp = jax.random.split(key)
    x = jax.random.normal(kx, (B, S, D), jnp.float32)

    # lower-triangular mask, 1.0 = attend
    mask = jnp.tril(jnp.ones((S, S), jnp.float32))[None].repeat(B, axis=0)

    params = make_params(kp, D, Dff)

    out = encoder_block(x, mask, params, num_heads=H)
    out = jax.block_until_ready(out)
    assert out.shape == (B, S, D)
    assert not bool(jnp.any(jnp.isnan(out)))

    # Tight check vs a reference that emulates the kernel's bf16-operand matmuls.
    ref_bf16 = encoder_block_ref(x, mask, params, num_heads=H,
                                 matmul_dtype=jnp.bfloat16)
    assert jnp.allclose(out, ref_bf16, atol=5e-3, rtol=5e-3), \
        "mismatch vs bf16-emulating reference"

    # Looser check vs the pure-f32 (PyTorch-semantics) reference.
    ref_f32 = encoder_block_ref(x, mask, params, num_heads=H)
    assert jnp.allclose(out, ref_f32, atol=2e-2, rtol=2e-2), \
        "mismatch vs f32 reference"

    print("KERNEL_OK")
</pallas_src>

<mosaic_0001>
module attributes {stable_mosaic.version = 11 : i64} {
  func.func @encoder_block_kernel(%arg0: i32, %arg1: i32, %arg2: memref<1x8x32xf32, #tpu.memory_space<vmem>>, %arg3: memref<1x8x32xf32, #tpu.memory_space<vmem>>, %arg4: memref<1x8x8xf32, #tpu.memory_space<vmem>>, %arg5: memref<32x32xbf16, #tpu.memory_space<vmem>>, %arg6: memref<1x32xf32, #tpu.memory_space<vmem>>, %arg7: memref<32x64xbf16, #tpu.memory_space<vmem>>, %arg8: memref<1x64xf32, #tpu.memory_space<vmem>>, %arg9: memref<32x32xbf16, #tpu.memory_space<vmem>>, %arg10: memref<1x32xf32, #tpu.memory_space<vmem>>, %arg11: memref<1x32xf32, #tpu.memory_space<vmem>>, %arg12: memref<1x32xf32, #tpu.memory_space<vmem>>, %arg13: memref<32x128xbf16, #tpu.memory_space<vmem>>, %arg14: memref<1x128xf32, #tpu.memory_space<vmem>>, %arg15: memref<128x32xbf16, #tpu.memory_space<vmem>>, %arg16: memref<1x32xf32, #tpu.memory_space<vmem>>, %arg17: memref<1x32xf32, #tpu.memory_space<vmem>>, %arg18: memref<1x32xf32, #tpu.memory_space<vmem>>, %arg19: memref<1x8x32xf32, #tpu.memory_space<vmem>>) attributes {dimension_semantics = [#tpu.dimension_semantics<parallel>, #tpu.dimension_semantics<parallel>], iteration_bounds = array<i64: 2, 1>, scalar_prefetch = 0 : i64, scratch_operands = 0 : i64, tpu.core_type = #tpu.core_type<tc>, window_params = [{transform_indices = @transform_0, window_bounds = array<i64: 1, 8, 32>}, {transform_indices = @transform_1, window_bounds = array<i64: 1, 8, 32>}, {transform_indices = @transform_2, window_bounds = array<i64: 1, 8, 8>}, {pipeline_mode = #tpu.pipeline_mode<synchronous>, transform_indices = @transform_3, window_bounds = array<i64: 32, 32>}, {pipeline_mode = #tpu.pipeline_mode<synchronous>, transform_indices = @transform_4, window_bounds = array<i64: 1, 32>}, {pipeline_mode = #tpu.pipeline_mode<synchronous>, transform_indices = @transform_5, window_bounds = array<i64: 32, 64>}, {pipeline_mode = #tpu.pipeline_mode<synchronous>, transform_indices = @transform_6, window_bounds = array<i64: 1, 64>}, {pipeline_mode = #tpu.pipeline_mode<synchronous>, transform_indices = @transform_7, window_bounds = array<i64: 32, 32>}, {pipeline_mode = #tpu.pipeline_mode<synchronous>, transform_indices = @transform_8, window_bounds = array<i64: 1, 32>}, {pipeline_mode = #tpu.pipeline_mode<synchronous>, transform_indices = @transform_9, window_bounds = array<i64: 1, 32>}, {pipeline_mode = #tpu.pipeline_mode<synchronous>, transform_indices = @transform_10, window_bounds = array<i64: 1, 32>}, {pipeline_mode = #tpu.pipeline_mode<synchronous>, transform_indices = @transform_11, window_bounds = array<i64: 32, 128>}, {pipeline_mode = #tpu.pipeline_mode<synchronous>, transform_indices = @transform_12, window_bounds = array<i64: 1, 128>}, {pipeline_mode = #tpu.pipeline_mode<synchronous>, transform_indices = @transform_13, window_bounds = array<i64: 128, 32>}, {pipeline_mode = #tpu.pipeline_mode<synchronous>, transform_indices = @transform_14, window_bounds = array<i64: 1, 32>}, {pipeline_mode = #tpu.pipeline_mode<synchronous>, transform_indices = @transform_15, window_bounds = array<i64: 1, 32>}, {pipeline_mode = #tpu.pipeline_mode<synchronous>, transform_indices = @transform_16, window_bounds = array<i64: 1, 32>}, {transform_indices = @transform_17, window_bounds = array<i64: 1, 8, 32>}]} {
    %c0 = arith.constant 0 : index
    %c0_0 = arith.constant 0 : index
    %c0_1 = arith.constant 0 : index
    %0 = vector.load %arg2[%c0, %c0_0, %c0_1] : memref<1x8x32xf32, #tpu.memory_space<vmem>>, vector<1x8x32xf32>
    %1 = vector.shape_cast %0 : vector<1x8x32xf32> to vector<8x32xf32>
    %c0_2 = arith.constant 0 : index
    %c0_3 = arith.constant 0 : index
    %c0_4 = arith.constant 0 : index
    %2 = vector.load %arg3[%c0_2, %c0_3, %c0_4] : memref<1x8x32xf32, #tpu.memory_space<vmem>>, vector<1x8x32xf32>
    %3 = vector.shape_cast %2 : vector<1x8x32xf32> to vector<8x32xf32>
    %c0_5 = arith.constant 0 : index
    %c0_6 = arith.constant 0 : index
    %c0_7 = arith.constant 0 : index
    %4 = vector.load %arg4[%c0_5, %c0_6, %c0_7] : memref<1x8x8xf32, #tpu.memory_space<vmem>>, vector<1x8x8xf32>
    %5 = vector.shape_cast %4 : vector<1x8x8xf32> to vector<8x8xf32>
    %cst = arith.constant 1.000000e+00 : f32
    %6 = vector.broadcast %cst : f32 to vector<8x8xf32>
    %7 = arith.subf %5, %6 : vector<8x8xf32>
    %cst_8 = arith.constant 1.000000e+09 : f32
    %8 = vector.broadcast %cst_8 : f32 to vector<8x8xf32>
    %9 = arith.mulf %7, %8 : vector<8x8xf32>
    %10 = arith.truncf %1 : vector<8x32xf32> to vector<8x32xbf16>
    %11 = arith.truncf %3 : vector<8x32xf32> to vector<8x32xbf16>
    %c0_9 = arith.constant 0 : index
    %c0_10 = arith.constant 0 : index
    %12 = vector.load %arg5[%c0_9, %c0_10] : memref<32x32xbf16, #tpu.memory_space<vmem>>, vector<32x32xbf16>
    %cst_11 = arith.constant dense<0.000000e+00> : vector<8x32xf32>
    %13 = tpu.matmul %10, %12, %cst_11 {dimension_numbers = #tpu.dot_dimension_numbers<[1], [0], [0], [1], [0, 0, 1, 1], [], []>} : vector<8x32xbf16>, vector<32x32xbf16>, vector<8x32xf32> -> vector<8x32xf32>
    %c0_12 = arith.constant 0 : index
    %c0_13 = arith.constant 0 : index
    %14 = vector.load %arg6[%c0_12, %c0_13] : memref<1x32xf32, #tpu.memory_space<vmem>>, vector<1x32xf32>
    %15 = vector.broadcast %14 : vector<1x32xf32> to vector<8x32xf32>
    %16 = arith.addf %13, %15 : vector<8x32xf32>
    %cst_14 = arith.constant 0.353553385 : f32
    %17 = vector.broadcast %cst_14 : f32 to vector<8x32xf32>
    %18 = arith.mulf %16, %17 : vector<8x32xf32>
    %c0_15 = arith.constant 0 : index
    %c0_16 = arith.constant 0 : index
    %19 = vector.load %arg7[%c0_15, %c0_16] : memref<32x64xbf16, #tpu.memory_space<vmem>>, vector<32x64xbf16>
    %cst_17 = arith.constant dense<0.000000e+00> : vector<8x64xf32>
    %20 = tpu.matmul %11, %19, %cst_17 {dimension_numbers = #tpu.dot_dimension_numbers<[1], [0], [0], [1], [0, 0, 1, 1], [], []>} : vector<8x32xbf16>, vector<32x64xbf16>, vector<8x64xf32> -> vector<8x64xf32>
    %c0_18 = arith.constant 0 : index
    %c0_19 = arith.constant 0 : index
    %21 = vector.load %arg8[%c0_18, %c0_19] : memref<1x64xf32, #tpu.memory_space<vmem>>, vector<1x64xf32>
    %22 = vector.broadcast %21 : vector<1x64xf32> to vector<8x64xf32>
    %23 = arith.addf %20, %22 : vector<8x64xf32>
    %24 = vector.extract_strided_slice %23 {offsets = [0, 0], sizes = [8, 32], strides = [1, 1]} : vector<8x64xf32> to vector<8x32xf32>
    %25 = vector.extract_strided_slice %23 {offsets = [0, 32], sizes = [8, 32], strides = [1, 1]} : vector<8x64xf32> to vector<8x32xf32>
    %26 = arith.truncf %18 : vector<8x32xf32> to vector<8x32xbf16>
    %27 = arith.truncf %24 : vector<8x32xf32> to vector<8x32xbf16>
    %28 = arith.truncf %25 : vector<8x32xf32> to vector<8x32xbf16>
    %c0_20 = arith.constant 0 : index
    %c0_21 = arith.constant 0 : index
    %29 = vector.load %arg9[%c0_20, %c0_21] : memref<32x32xbf16, #tpu.memory_space<vmem>>, vector<32x32xbf16>
    %cst_22 = arith.constant 0.000000e+00 : f32
    %30 = vector.broadcast %cst_22 : f32 to vector<8x32xf32>
    %31 = vector.extract_strided_slice %26 {offsets = [0, 0], sizes = [8, 8], strides = [1, 1]} : vector<8x32xbf16> to vector<8x8xbf16>
    %32 = vector.extract_strided_slice %27 {offsets = [0, 0], sizes = [8, 8], strides = [1, 1]} : vector<8x32xbf16> to vector<8x8xbf16>
    %33 = vector.extract_strided_slice %28 {offsets = [0, 0], sizes = [8, 8], strides = [1, 1]} : vector<8x32xbf16> to vector<8x8xbf16>
    %34 = tpu.transpose %32, [1, 0] : vector<8x8xbf16> -> vector<8x8xbf16>
    %cst_23 = arith.constant dense<0.000000e+00> : vector<8x8xf32>
    %35 = tpu.matmul %31, %34, %cst_23 {dimension_numbers = #tpu.dot_dimension_numbers<[1], [0], [0], [1], [0, 0, 1, 1], [], []>} : vector<8x8xbf16>, vector<8x8xbf16>, vector<8x8xf32> -> vector<8x8xf32>
    %36 = arith.addf %35, %9 : vector<8x8xf32>
    %cst_24 = arith.constant dense<0xFF800000> : vector<8xf32>
    %37 = vector.multi_reduction <maximumf>, %36, %cst_24 [1] : vector<8x8xf32> to vector<8xf32>
    %38 = vector.shape_cast %37 : vector<8xf32> to vector<8x1xf32>
    %39 = vector.broadcast %38 : vector<8x1xf32> to vector<8x8xf32>
    %40 = arith.subf %36, %39 : vector<8x8xf32>
    %41 = math.exp %40 : vector<8x8xf32>
    %cst_25 = arith.constant dense<0.000000e+00> : vector<8xf32>
    %42 = vector.multi_reduction <add>, %41, %cst_25 [1] : vector<8x8xf32> to vector<8xf32>
    %43 = vector.shape_cast %42 : vector<8xf32> to vector<8x1xf32>
    %44 = tpu.reciprocal %43 {approx = true} : vector<8x1xf32> -> vector<8x1xf32>
    %45 = vector.broadcast %44 : vector<8x1xf32> to vector<8x8xf32>
    %46 = arith.mulf %41, %45 : vector<8x8xf32>
    %47 = arith.truncf %46 : vector<8x8xf32> to vector<8x8xbf16>
    %cst_26 = arith.constant dense<0.000000e+00> : vector<8x8xf32>
    %48 = tpu.matmul %47, %33, %cst_26 {dimension_numbers = #tpu.dot_dimension_numbers<[1], [0], [0], [1], [0, 0, 1, 1], [], []>} : vector<8x8xbf16>, vector<8x8xbf16>, vector<8x8xf32> -> vector<8x8xf32>
    %49 = arith.truncf %48 : vector<8x8xf32> to vector<8x8xbf16>
    %50 = vector.extract_strided_slice %29 {offsets = [0, 0], sizes = [8, 32], strides = [1, 1]} : vector<32x32xbf16> to vector<8x32xbf16>
    %cst_27 = arith.constant dense<0.000000e+00> : vector<8x32xf32>
    %51 = tpu.matmul %49, %50, %cst_27 {dimension_numbers = #tpu.dot_dimension_numbers<[1], [0], [0], [1], [0, 0, 1, 1], [], []>} : vector<8x8xbf16>, vector<8x32xbf16>, vector<8x32xf32> -> vector<8x32xf32>
    %52 = arith.addf %30, %51 : vector<8x32xf32>
    %53 = vector.extract_strided_slice %26 {offsets = [0, 8], sizes = [8, 8], strides = [1, 1]} : vector<8x32xbf16> to vector<8x8xbf16>
    %54 = vector.extract_strided_slice %27 {offsets = [0, 8], sizes = [8, 8], strides = [1, 1]} : vector<8x32xbf16> to vector<8x8xbf16>
    %55 = vector.extract_strided_slice %28 {offsets = [0, 8], sizes = [8, 8], strides = [1, 1]} : vector<8x32xbf16> to vector<8x8xbf16>
    %56 = tpu.transpose %54, [1, 0] : vector<8x8xbf16> -> vector<8x8xbf16>
    %cst_28 = arith.constant dense<0.000000e+00> : vector<8x8xf32>
    %57 = tpu.matmul %53, %56, %cst_28 {dimension_numbers = #tpu.dot_dimension_numbers<[1], [0], [0], [1], [0, 0, 1, 1], [], []>} : vector<8x8xbf16>, vector<8x8xbf16>, vector<8x8xf32> -> vector<8x8xf32>
    %58 = arith.addf %57, %9 : vector<8x8xf32>
    %cst_29 = arith.constant dense<0xFF800000> : vector<8xf32>
    %59 = vector.multi_reduction <maximumf>, %58, %cst_29 [1] : vector<8x8xf32> to vector<8xf32>
    %60 = vector.shape_cast %59 : vector<8xf32> to vector<8x1xf32>
    %61 = vector.broadcast %60 : vector<8x1xf32> to vector<8x8xf32>
    %62 = arith.subf %58, %61 : vector<8x8xf32>
    %63 = math.exp %62 : vector<8x8xf32>
    %cst_30 = arith.constant dense<0.000000e+00> : vector<8xf32>
    %64 = vector.multi_reduction <add>, %63, %cst_30 [1] : vector<8x8xf32> to vector<8xf32>
    %65 = vector.shape_cast %64 : vector<8xf32> to vector<8x1xf32>
    %66 = tpu.reciprocal %65 {approx = true} : vector<8x1xf32> -> vector<8x1xf32>
    %67 = vector.broadcast %66 : vector<8x1xf32> to vector<8x8xf32>
    %68 = arith.mulf %63, %67 : vector<8x8xf32>
    %69 = arith.truncf %68 : vector<8x8xf32> to vector<8x8xbf16>
    %cst_31 = arith.constant dense<0.000000e+00> : vector<8x8xf32>
    %70 = tpu.matmul %69, %55, %cst_31 {dimension_numbers = #tpu.dot_dimension_numbers<[1], [0], [0], [1], [0, 0, 1, 1], [], []>} : vector<8x8xbf16>, vector<8x8xbf16>, vector<8x8xf32> -> vector<8x8xf32>
    %71 = arith.truncf %70 : vector<8x8xf32> to vector<8x8xbf16>
    %72 = vector.extract_strided_slice %29 {offsets = [8, 0], sizes = [8, 32], strides = [1, 1]} : vector<32x32xbf16> to vector<8x32xbf16>
    %cst_32 = arith.constant dense<0.000000e+00> : vector<8x32xf32>
    %73 = tpu.matmul %71, %72, %cst_32 {dimension_numbers = #tpu.dot_dimension_numbers<[1], [0], [0], [1], [0, 0, 1, 1], [], []>} : vector<8x8xbf16>, vector<8x32xbf16>, vector<8x32xf32> -> vector<8x32xf32>
    %74 = arith.addf %52, %73 : vector<8x32xf32>
    %75 = vector.extract_strided_slice %26 {offsets = [0, 16], sizes = [8, 8], strides = [1, 1]} : vector<8x32xbf16> to vector<8x8xbf16>
    %76 = vector.extract_strided_slice %27 {offsets = [0, 16], sizes = [8, 8], strides = [1, 1]} : vector<8x32xbf16> to vector<8x8xbf16>
    %77 = vector.extract_strided_slice %28 {offsets = [0, 16], sizes = [8, 8], strides = [1, 1]} : vector<8x32xbf16> to vector<8x8xbf16>
    %78 = tpu.transpose %76, [1, 0] : vector<8x8xbf16> -> vector<8x8xbf16>
    %cst_33 = arith.constant dense<0.000000e+00> : vector<8x8xf32>
    %79 = tpu.matmul %75, %78, %cst_33 {dimension_numbers = #tpu.dot_dimension_numbers<[1], [0], [0], [1], [0, 0, 1, 1], [], []>} : vector<8x8xbf16>, vector<8x8xbf16>, vector<8x8xf32> -> vector<8x8xf32>
    %80 = arith.addf %79, %9 : vector<8x8xf32>
    %cst_34 = arith.constant dense<0xFF800000> : vector<8xf32>
    %81 = vector.multi_reduction <maximumf>, %80, %cst_34 [1] : vector<8x8xf32> to vector<8xf32>
    %82 = vector.shape_cast %81 : vector<8xf32> to vector<8x1xf32>
    %83 = vector.broadcast %82 : vector<8x1xf32> to vector<8x8xf32>
    %84 = arith.subf %80, %83 : vector<8x8xf32>
    %85 = math.exp %84 : vector<8x8xf32>
    %cst_35 = arith.constant dense<0.000000e+00> : vector<8xf32>
    %86 = vector.multi_reduction <add>, %85, %cst_35 [1] : vector<8x8xf32> to vector<8xf32>
    %87 = vector.shape_cast %86 : vector<8xf32> to vector<8x1xf32>
    %88 = tpu.reciprocal %87 {approx = true} : vector<8x1xf32> -> vector<8x1xf32>
    %89 = vector.broadcast %88 : vector<8x1xf32> to vector<8x8xf32>
    %90 = arith.mulf %85, %89 : vector<8x8xf32>
    %91 = arith.truncf %90 : vector<8x8xf32> to vector<8x8xbf16>
    %cst_36 = arith.constant dense<0.000000e+00> : vector<8x8xf32>
    %92 = tpu.matmul %91, %77, %cst_36 {dimension_numbers = #tpu.dot_dimension_numbers<[1], [0], [0], [1], [0, 0, 1, 1], [], []>} : vector<8x8xbf16>, vector<8x8xbf16>, vector<8x8xf32> -> vector<8x8xf32>
    %93 = arith.truncf %92 : vector<8x8xf32> to vector<8x8xbf16>
    %94 = vector.extract_strided_slice %29 {offsets = [16, 0], sizes = [8, 32], strides = [1, 1]} : vector<32x32xbf16> to vector<8x32xbf16>
    %cst_37 = arith.constant dense<0.000000e+00> : vector<8x32xf32>
    %95 = tpu.matmul %93, %94, %cst_37 {dimension_numbers = #tpu.dot_dimension_numbers<[1], [0], [0], [1], [0, 0, 1, 1], [], []>} : vector<8x8xbf16>, vector<8x32xbf16>, vector<8x32xf32> -> vector<8x32xf32>
    %96 = arith.addf %74, %95 : vector<8x32xf32>
    %97 = vector.extract_strided_slice %26 {offsets = [0, 24], sizes = [8, 8], strides = [1, 1]} : vector<8x32xbf16> to vector<8x8xbf16>
    %98 = vector.extract_strided_slice %27 {offsets = [0, 24], sizes = [8, 8], strides = [1, 1]} : vector<8x32xbf16> to vector<8x8xbf16>
    %99 = vector.extract_strided_slice %28 {offsets = [0, 24], sizes = [8, 8], strides = [1, 1]} : vector<8x32xbf16> to vector<8x8xbf16>
    %100 = tpu.transpose %98, [1, 0] : vector<8x8xbf16> -> vector<8x8xbf16>
    %cst_38 = arith.constant dense<0.000000e+00> : vector<8x8xf32>
    %101 = tpu.matmul %97, %100, %cst_38 {dimension_numbers = #tpu.dot_dimension_numbers<[1], [0], [0], [1], [0, 0, 1, 1], [], []>} : vector<8x8xbf16>, vector<8x8xbf16>, vector<8x8xf32> -> vector<8x8xf32>
    %102 = arith.addf %101, %9 : vector<8x8xf32>
    %cst_39 = arith.constant dense<0xFF800000> : vector<8xf32>
    %103 = vector.multi_reduction <maximumf>, %102, %cst_39 [1] : vector<8x8xf32> to vector<8xf32>
    %104 = vector.shape_cast %103 : vector<8xf32> to vector<8x1xf32>
    %105 = vector.broadcast %104 : vector<8x1xf32> to vector<8x8xf32>
    %106 = arith.subf %102, %105 : vector<8x8xf32>
    %107 = math.exp %106 : vector<8x8xf32>
    %cst_40 = arith.constant dense<0.000000e+00> : vector<8xf32>
    %108 = vector.multi_reduction <add>, %107, %cst_40 [1] : vector<8x8xf32> to vector<8xf32>
    %109 = vector.shape_cast %108 : vector<8xf32> to vector<8x1xf32>
    %110 = tpu.reciprocal %109 {approx = true} : vector<8x1xf32> -> vector<8x1xf32>
    %111 = vector.broadcast %110 : vector<8x1xf32> to vector<8x8xf32>
    %112 = arith.mulf %107, %111 : vector<8x8xf32>
    %113 = arith.truncf %112 : vector<8x8xf32> to vector<8x8xbf16>
    %cst_41 = arith.constant dense<0.000000e+00> : vector<8x8xf32>
    %114 = tpu.matmul %113, %99, %cst_41 {dimension_numbers = #tpu.dot_dimension_numbers<[1], [0], [0], [1], [0, 0, 1, 1], [], []>} : vector<8x8xbf16>, vector<8x8xbf16>, vector<8x8xf32> -> vector<8x8xf32>
    %115 = arith.truncf %114 : vector<8x8xf32> to vector<8x8xbf16>
    %116 = vector.extract_strided_slice %29 {offsets = [24, 0], sizes = [8, 32], strides = [1, 1]} : vector<32x32xbf16> to vector<8x32xbf16>
    %cst_42 = arith.constant dense<0.000000e+00> : vector<8x32xf32>
    %117 = tpu.matmul %115, %116, %cst_42 {dimension_numbers = #tpu.dot_dimension_numbers<[1], [0], [0], [1], [0, 0, 1, 1], [], []>} : vector<8x8xbf16>, vector<8x32xbf16>, vector<8x32xf32> -> vector<8x32xf32>
    %118 = arith.addf %96, %117 : vector<8x32xf32>
    %c0_43 = arith.constant 0 : index
    %c0_44 = arith.constant 0 : index
    %119 = vector.load %arg10[%c0_43, %c0_44] : memref<1x32xf32, #tpu.memory_space<vmem>>, vector<1x32xf32>
    %120 = vector.broadcast %119 : vector<1x32xf32> to vector<8x32xf32>
    %121 = arith.addf %118, %120 : vector<8x32xf32>
    %122 = arith.addf %121, %1 : vector<8x32xf32>
    %c0_45 = arith.constant 0 : index
    %c0_46 = arith.constant 0 : index
    %123 = vector.load %arg11[%c0_45, %c0_46] : memref<1x32xf32, #tpu.memory_space<vmem>>, vector<1x32xf32>
    %c0_47 = arith.constant 0 : index
    %c0_48 = arith.constant 0 : index
    %124 = vector.load %arg12[%c0_47, %c0_48] : memref<1x32xf32, #tpu.memory_space<vmem>>, vector<1x32xf32>
    %cst_49 = arith.constant dense<0.000000e+00> : vector<8xf32>
    %125 = vector.multi_reduction <add>, %122, %cst_49 [1] : vector<8x32xf32> to vector<8xf32>
    %126 = vector.shape_cast %125 : vector<8xf32> to vector<8x1xf32>
    %cst_50 = arith.constant 3.200000e+01 : f32
    %127 = vector.broadcast %cst_50 : f32 to vector<8x1xf32>
    %128 = arith.divf %126, %127 : vector<8x1xf32>
    %129 = vector.broadcast %128 : vector<8x1xf32> to vector<8x32xf32>
    %130 = arith.subf %122, %129 : vector<8x32xf32>
    %131 = arith.mulf %130, %130 : vector<8x32xf32>
    %cst_51 = arith.constant dense<0.000000e+00> : vector<8xf32>
    %132 = vector.multi_reduction <add>, %131, %cst_51 [1] : vector<8x32xf32> to vector<8xf32>
    %133 = vector.shape_cast %132 : vector<8xf32> to vector<8x1xf32>
    %cst_52 = arith.constant 3.200000e+01 : f32
    %134 = vector.broadcast %cst_52 : f32 to vector<8x1xf32>
    %135 = arith.divf %133, %134 : vector<8x1xf32>
    %cst_53 = arith.constant 9.99999974E-6 : f32
    %136 = vector.broadcast %cst_53 : f32 to vector<8x1xf32>
    %137 = arith.addf %135, %136 : vector<8x1xf32>
    %138 = math.rsqrt %137 : vector<8x1xf32>
    %139 = vector.broadcast %138 : vector<8x1xf32> to vector<8x32xf32>
    %140 = arith.mulf %130, %139 : vector<8x32xf32>
    %141 = vector.broadcast %123 : vector<1x32xf32> to vector<8x32xf32>
    %142 = arith.mulf %140, %141 : vector<8x32xf32>
    %143 = vector.broadcast %124 : vector<1x32xf32> to vector<8x32xf32>
    %144 = arith.addf %142, %143 : vector<8x32xf32>
    %145 = arith.truncf %144 : vector<8x32xf32> to vector<8x32xbf16>
    %c0_54 = arith.constant 0 : index
    %c0_55 = arith.constant 0 : index
    %146 = vector.load %arg13[%c0_54, %c0_55] : memref<32x128xbf16, #tpu.memory_space<vmem>>, vector<32x128xbf16>
    %cst_56 = arith.constant dense<0.000000e+00> : vector<8x128xf32>
    %147 = tpu.matmul %145, %146, %cst_56 {dimension_numbers = #tpu.dot_dimension_numbers<[1], [0], [0], [1], [0, 0, 1, 1], [], []>} : vector<8x32xbf16>, vector<32x128xbf16>, vector<8x128xf32> -> vector<8x128xf32>
    %c0_57 = arith.constant 0 : index
    %c0_58 = arith.constant 0 : index
    %148 = vector.load %arg14[%c0_57, %c0_58] : memref<1x128xf32, #tpu.memory_space<vmem>>, vector<1x128xf32>
    %149 = vector.broadcast %148 : vector<1x128xf32> to vector<8x128xf32>
    %150 = arith.addf %147, %149 : vector<8x128xf32>
    %cst_59 = arith.constant 0.000000e+00 : f32
    %151 = vector.broadcast %cst_59 : f32 to vector<8x128xf32>
    %152 = arith.maximumf %150, %151 : vector<8x128xf32>
    %153 = arith.truncf %152 : vector<8x128xf32> to vector<8x128xbf16>
    %c0_60 = arith.constant 0 : index
    %c0_61 = arith.constant 0 : index
    %154 = vector.load %arg15[%c0_60, %c0_61] : memref<128x32xbf16, #tpu.memory_space<vmem>>, vector<128x32xbf16>
    %cst_62 = arith.constant dense<0.000000e+00> : vector<8x32xf32>
    %155 = tpu.matmul %153, %154, %cst_62 {dimension_numbers = #tpu.dot_dimension_numbers<[1], [0], [0], [1], [0, 0, 1, 1], [], []>} : vector<8x128xbf16>, vector<128x32xbf16>, vector<8x32xf32> -> vector<8x32xf32>
    %c0_63 = arith.constant 0 : index
    %c0_64 = arith.constant 0 : index
    %156 = vector.load %arg16[%c0_63, %c0_64] : memref<1x32xf32, #tpu.memory_space<vmem>>, vector<1x32xf32>
    %157 = vector.broadcast %156 : vector<1x32xf32> to vector<8x32xf32>
    %158 = arith.addf %155, %157 : vector<8x32xf32>
    %159 = arith.addf %158, %144 : vector<8x32xf32>
    %c0_65 = arith.constant 0 : index
    %c0_66 = arith.constant 0 : index
    %160 = vector.load %arg17[%c0_65, %c0_66] : memref<1x32xf32, #tpu.memory_space<vmem>>, vector<1x32xf32>
    %c0_67 = arith.constant 0 : index
    %c0_68 = arith.constant 0 : index
    %161 = vector.load %arg18[%c0_67, %c0_68] : memref<1x32xf32, #tpu.memory_space<vmem>>, vector<1x32xf32>
    %cst_69 = arith.constant dense<0.000000e+00> : vector<8xf32>
    %162 = vector.multi_reduction <add>, %159, %cst_69 [1] : vector<8x32xf32> to vector<8xf32>
    %163 = vector.shape_cast %162 : vector<8xf32> to vector<8x1xf32>
    %cst_70 = arith.constant 3.200000e+01 : f32
    %164 = vector.broadcast %cst_70 : f32 to vector<8x1xf32>
    %165 = arith.divf %163, %164 : vector<8x1xf32>
    %166 = vector.broadcast %165 : vector<8x1xf32> to vector<8x32xf32>
    %167 = arith.subf %159, %166 : vector<8x32xf32>
    %168 = arith.mulf %167, %167 : vector<8x32xf32>
    %cst_71 = arith.constant dense<0.000000e+00> : vector<8xf32>
    %169 = vector.multi_reduction <add>, %168, %cst_71 [1] : vector<8x32xf32> to vector<8xf32>
    %170 = vector.shape_cast %169 : vector<8xf32> to vector<8x1xf32>
    %cst_72 = arith.constant 3.200000e+01 : f32
    %171 = vector.broadcast %cst_72 : f32 to vector<8x1xf32>
    %172 = arith.divf %170, %171 : vector<8x1xf32>
    %cst_73 = arith.constant 9.99999974E-6 : f32
    %173 = vector.broadcast %cst_73 : f32 to vector<8x1xf32>
    %174 = arith.addf %172, %173 : vector<8x1xf32>
    %175 = math.rsqrt %174 : vector<8x1xf32>
    %176 = vector.broadcast %175 : vector<8x1xf32> to vector<8x32xf32>
    %177 = arith.mulf %167, %176 : vector<8x32xf32>
    %178 = vector.broadcast %160 : vector<1x32xf32> to vector<8x32xf32>
    %179 = arith.mulf %177, %178 : vector<8x32xf32>
    %180 = vector.broadcast %161 : vector<1x32xf32> to vector<8x32xf32>
    %181 = arith.addf %179, %180 : vector<8x32xf32>
    %c0_74 = arith.constant 0 : index
    %c0_75 = arith.constant 0 : index
    %c0_76 = arith.constant 0 : index
    %182 = vector.load %arg19[%c0_74, %c0_75, %c0_76] : memref<1x8x32xf32, #tpu.memory_space<vmem>>, vector<1x8x32xf32>
    %183 = vector.shape_cast %182 : vector<1x8x32xf32> to vector<8x32xf32>
    %184 = vector.shape_cast %181 : vector<8x32xf32> to vector<1x8x32xf32>
    tpu.vector_store %arg19[%c0_74, %c0_75, %c0_76], %184 {strides = array<i32>} : memref<1x8x32xf32, #tpu.memory_space<vmem>>, vector<1x8x32xf32>,
    return
  }
  func.func @transform_0(%arg0: i32, %arg1: i32) -> (i32, i32, i32) {
    %c0_i32 = arith.constant 0 : i32
    %c0_i32_0 = arith.constant 0 : i32
    return %arg0, %arg1, %c0_i32 : i32, i32, i32
  }
  func.func @transform_1(%arg0: i32, %arg1: i32) -> (i32, i32, i32) {
    %c0_i32 = arith.constant 0 : i32
    %c0_i32_0 = arith.constant 0 : i32
    %c0_i32_1 = arith.constant 0 : i32
    return %arg0, %c0_i32, %c0_i32_0 : i32, i32, i32
  }
  func.func @transform_2(%arg0: i32, %arg1: i32) -> (i32, i32, i32) {
    %c0_i32 = arith.constant 0 : i32
    %c0_i32_0 = arith.constant 0 : i32
    return %arg0, %arg1, %c0_i32 : i32, i32, i32
  }
  func.func @transform_3(%arg0: i32, %arg1: i32) -> (i32, i32) {
    %c0_i32 = arith.constant 0 : i32
    %c0_i32_0 = arith.constant 0 : i32
    %c0_i32_1 = arith.constant 0 : i32
    return %c0_i32, %c0_i32_0 : i32, i32
  }
  func.func @transform_4(%arg0: i32, %arg1: i32) -> (i32, i32) {
    %c0_i32 = arith.constant 0 : i32
    %c0_i32_0 = arith.constant 0 : i32
    %c0_i32_1 = arith.constant 0 : i32
    return %c0_i32, %c0_i32_0 : i32, i32
  }
  func.func @transform_5(%arg0: i32, %arg1: i32) -> (i32, i32) {
    %c0_i32 = arith.constant 0 : i32
    %c0_i32_0 = arith.constant 0 : i32
    %c0_i32_1 = arith.constant 0 : i32
    return %c0_i32, %c0_i32_0 : i32, i32
  }
  func.func @transform_6(%arg0: i32, %arg1: i32) -> (i32, i32) {
    %c0_i32 = arith.constant 0 : i32
    %c0_i32_0 = arith.constant 0 : i32
    %c0_i32_1 = arith.constant 0 : i32
    return %c0_i32, %c0_i32_0 : i32, i32
  }
  func.func @transform_7(%arg0: i32, %arg1: i32) -> (i32, i32) {
    %c0_i32 = arith.constant 0 : i32
    %c0_i32_0 = arith.constant 0 : i32
    %c0_i32_1 = arith.constant 0 : i32
    return %c0_i32, %c0_i32_0 : i32, i32
  }
  func.func @transform_8(%arg0: i32, %arg1: i32) -> (i32, i32) {
    %c0_i32 = arith.constant 0 : i32
    %c0_i32_0 = arith.constant 0 : i32
    %c0_i32_1 = arith.constant 0 : i32
    return %c0_i32, %c0_i32_0 : i32, i32
  }
  func.func @transform_9(%arg0: i32, %arg1: i32) -> (i32, i32) {
    %c0_i32 = arith.constant 0 : i32
    %c0_i32_0 = arith.constant 0 : i32
    %c0_i32_1 = arith.constant 0 : i32
    return %c0_i32, %c0_i32_0 : i32, i32
  }
  func.func @transform_10(%arg0: i32, %arg1: i32) -> (i32, i32) {
    %c0_i32 = arith.constant 0 : i32
    %c0_i32_0 = arith.constant 0 : i32
    %c0_i32_1 = arith.constant 0 : i32
    return %c0_i32, %c0_i32_0 : i32, i32
  }
  func.func @transform_11(%arg0: i32, %arg1: i32) -> (i32, i32) {
    %c0_i32 = arith.constant 0 : i32
    %c0_i32_0 = arith.constant 0 : i32
    %c0_i32_1 = arith.constant 0 : i32
    return %c0_i32, %c0_i32_0 : i32, i32
  }
  func.func @transform_12(%arg0: i32, %arg1: i32) -> (i32, i32) {
    %c0_i32 = arith.constant 0 : i32
    %c0_i32_0 = arith.constant 0 : i32
    %c0_i32_1 = arith.constant 0 : i32
    return %c0_i32, %c0_i32_0 : i32, i32
  }
  func.func @transform_13(%arg0: i32, %arg1: i32) -> (i32, i32) {
    %c0_i32 = arith.constant 0 : i32
    %c0_i32_0 = arith.constant 0 : i32
    %c0_i32_1 = arith.constant 0 : i32
    return %c0_i32, %c0_i32_0 : i32, i32
  }
  func.func @transform_14(%arg0: i32, %arg1: i32) -> (i32, i32) {
    %c0_i32 = arith.constant 0 : i32
    %c0_i32_0 = arith.constant 0 : i32
    %c0_i32_1 = arith.constant 0 : i32
    return %c0_i32, %c0_i32_0 : i32, i32
  }
  func.func @transform_15(%arg0: i32, %arg1: i32) -> (i32, i32) {
    %c0_i32 = arith.constant 0 : i32
    %c0_i32_0 = arith.constant 0 : i32
    %c0_i32_1 = arith.constant 0 : i32
    return %c0_i32, %c0_i32_0 : i32, i32
  }
  func.func @transform_16(%arg0: i32, %arg1: i32) -> (i32, i32) {
    %c0_i32 = arith.constant 0 : i32
    %c0_i32_0 = arith.constant 0 : i32
    %c0_i32_1 = arith.constant 0 : i32
    return %c0_i32, %c0_i32_0 : i32, i32
  }
  func.func @transform_17(%arg0: i32, %arg1: i32) -> (i32, i32, i32) {
    %c0_i32 = arith.constant 0 : i32
    %c0_i32_0 = arith.constant 0 : i32
    return %arg0, %arg1, %c0_i32 : i32, i32, i32
  }
}

</mosaic_0001>

<bundles_post_ra>
// kernel: tpu_custom_call.1
= control target key start
LH: loop header
LB: loop body
LE: loop exit
PB: predicated region body
PF: predicated region fallthrough
CT: control target
= control target key end

     0   :  { %s4084_s0 = inlined_call_operand.hbm [shape: f32[2,8,32], index: 0, kind: input, shape index: {}]   ;;  %s4085_s1 = inlined_call_operand.hbm [shape: f32[2,8,32], index: 1, kind: input, shape index: {}]   ;;  %s4086_s2 = inlined_call_operand.hbm [shape: f32[2,8,8], index: 2, kind: input, shape index: {}]   ;;  %s4087_s3 = inlined_call_operand.hbm [shape: bf16[32,32], index: 3, kind: input, shape index: {}]   ;;  %s4088_s4 = inlined_call_operand.hbm [shape: f32[1,32], index: 4, kind: input, shape index: {}]   ;;  %s4089_s5 = inlined_call_operand.hbm [shape: bf16[32,64], index: 5, kind: input, shape index: {}]   ;;  %s4090_s6 = inlined_call_operand.hbm [shape: f32[1,64], index: 6, kind: input, shape index: {}]   ;;  %s4091_s7 = inlined_call_operand.hbm [shape: bf16[32,32], index: 7, kind: input, shape index: {}]   ;;  %s4092_s8 = inlined_call_operand.hbm [shape: f32[1,32], index: 8, kind: input, shape index: {}]   ;;  %s4093_s9 = inlined_call_operand.hbm [shape: f32[1,32], index: 9, kind: input, shape index: {}]   ;;  %s4094_s10 = inlined_call_operand.hbm [shape: f32[1,32], index: 10, kind: input, shape index: {}]   ;;  %s4095_s11 = inlined_call_operand.hbm [shape: bf16[32,128], index: 11, kind: input, shape index: {}]   ;;  %s4096_s12 = inlined_call_operand.hbm [shape: f32[1,128], index: 12, kind: input, shape index: {}]   ;;  %s4097_s13 = inlined_call_operand.hbm [shape: bf16[128,32], index: 13, kind: input, shape index: {}]   ;;  %s4098_s14 = inlined_call_operand.hbm [shape: f32[1,32], index: 14, kind: input, shape index: {}]   ;;  %s4099_s15 = inlined_call_operand.hbm [shape: f32[1,32], index: 15, kind: input, shape index: {}]   ;;  %s4100_s16 = inlined_call_operand.hbm [shape: f32[1,32], index: 16, kind: input, shape index: {}]   ;;  %s4101_s17 = inlined_call_operand.hbm [shape: f32[2,8,32], index: 17, kind: output, shape index: {}]  }
   0x1   :  { %4131 = sst [smem:[#allocation44_spill]] %s4084_s0 }
   0x2   :  { %4132 = sst [smem:[#allocation45_spill]] %s4085_s1 }
   0x3   :  { %4133 = sst [smem:[#allocation46_spill]] %s4086_s2 }
   0x4   :  { %4134 = sst [smem:[#allocation47_spill]] %s4087_s3 }
   0x5   :  { %4135 = sst [smem:[#allocation48_spill]] %s4088_s4 }
   0x6   :  { %4136 = sst [smem:[#allocation49_spill]] %s4089_s5 }
   0x7   :  { %4137 = sst [smem:[#allocation50_spill]] %s4090_s6 }
   0x8   :  { %4138 = sst [smem:[#allocation51_spill]] %s4091_s7 }
   0x9   :  { %4139 = sst [smem:[#allocation52_spill]] %s4092_s8 }
   0xa   :  { %4140 = sst [smem:[#allocation53_spill]] %s4093_s9 }
   0xb   :  { %4141 = sst [smem:[#allocation54_spill]] %s4094_s10 }
   0xc   :  { %4142 = sst [smem:[#allocation55_spill]] %s4095_s11 }
   0xd   :  { %4143 = sst [smem:[#allocation56_spill]] %s4096_s12 }
   0xe   :  { %4144 = sst [smem:[#allocation57_spill]] %s4097_s13 }
   0xf   :  { %4145 = sst [smem:[#allocation58_spill]] %s4098_s14 }
  0x10   :  { %4146 = sst [smem:[#allocation59_spill]] %s4099_s15 }
  0x11   :  { %4147 = sst [smem:[#allocation60_spill]] %s4100_s16 }
  0x12   :  { %4148 = sst [smem:[#allocation61_spill]] %s4101_s17 }
  0x13   :  { %22 = vsyncpa [#allocation3], 0 }
  0x14   :  { %24 = vsyncpa [#allocation3 + $0x1], 0 }
  0x15   :  { %25 = vsyncpa [#allocation6], 0 }
  0x16   :  { %27 = vsyncpa [#allocation6 + $0x1], 0 }
  0x17   :  { %28 = vsyncpa [#allocation9], 0 }
  0x18   :  { %29 = vsyncpa [#allocation12], 0 }
  0x19   :  { %30 = vsyncpa [#allocation15], 0 }
  0x1a   :  { %31 = vsyncpa [#allocation18], 0 }
  0x1b   :  { %32 = vsyncpa [#allocation21], 0 }
  0x1c   :  { %33 = vsyncpa [#allocation24], 0 }
  0x1d   :  { %34 = vsyncpa [#allocation27], 0 }
  0x1e   :  { %35 = vsyncpa [#allocation4], 0 }
  0x1f   :  { %37 = vsyncpa [#allocation4 + $0x1], 0  ;;  %s3359_s24 = smov 0   ;;  %s3361_s25 = smov 0  }
  0x20   :  { %s3363_s26 = smov 0   ;;  %s3365_s27 = smov 0  }
  0x21   :  { %s3367_s28 = smov 0   ;;  %s3369_s29 = smov 0  }
  0x22 LB: > { %4149 = sst [smem:[#allocation40_spill]] %s3230_s27  ;;  %s3390_s0 = sadd.s32 4294967295, %s3238_s29   ;;  %s3238_s29 = sphi %s3369_s29, %s43_s29   ;;  %s3234_s28 = sphi %s3367_s28, %s4210_s28   ;;  %s3230_s27 = sphi %s3365_s27, %s4209_s27   ;;  %s3226_s26 = sphi %s3363_s26, %s4213_s26   ;;  %s3222_s25 = sphi %s3361_s25, %s4212_s25   ;;  %s3218_s24 = sphi %s3359_s24, %s4211_s24  }
  0x23   : > { %4150 = sst [smem:[#allocation41_spill]] %s3234_s28  ;;  %p2142_p0 = scmp.ge.s32.totalorder %s3238_s29, 1 }
  0x24   : > { %p4112_p1 = scmp.eq.s32.totalorder %s3390_s0, 0  ;;  %p464_p2 = scmp.lt.s32.totalorder %s3238_s29, 3 }
  0x25   : > { %s3240_s18 = smov [#allocation8]   ;;  %s3241_s20 = smov [#allocation11]  }
  0x26   : > { %p3395_p3 = pnand %p2142_p0, %p464_p2  ;;  %s476_s19 = sshll.u32 %s3240_s18, 4  ;;  %s3399_s19 = int_to_ptr.vmem [resolvable:$true] %s476_s19 }
  0x27   : > { %s500_s21 = sshll.u32 %s3241_s20, 4  ;;  %s3242_s22 = smov [#allocation14]   ;;  %s3410_s21 = int_to_ptr.vmem [resolvable:$true] %s500_s21 }
  0x28   : > { %s4151_s30 = scalar_select %p3395_p3, 1, 0 }
  0x29   : > { %p2448_p4 = pneg %p3395_p3  ;;  %s3412_s23 = sshll.u32 %s3242_s22, 4  ;;  %s525_s23 = int_to_ptr.vmem [resolvable:$true] %s3412_s23 }
  0x2a   : > { %4152 = sst [smem:[#allocation42_spill]] %s4151_s30  ;;  %s4154_s3 = sld [smem:[#allocation47_spill]] }
  0x2b   : > { %p3406_p6 = pnand %p2448_p4, %p4112_p1 }
  0x2d   : > { %s4153_s1 = scalar_select %p3406_p6, 1, 0 }
  0x2e   : > { %p3422_p8 = pneg %p3406_p6 }
  0x30   : > { %s2642_s27 = scalar_lea.hbm %s4154_s3, 256 }
  0x31   : > { %p2643_p7 = scmp.ne.s32.totalorder %s4154_s3, %s2642_s27  ;;  %p2649_p11 = scmp.lt.u32.totalorder %s2642_s27, %s4154_s3 }
  0x32   : > { %s4155_s16 = scalar_select %p3422_p8, 1, 0 }
  0x33   : > { %p2645_p9 = pnand %p3422_p8, %p2643_p7 }
  0x35   : > { %p2646_p10 = pneg %p2645_p9 }
  0x37   : > { %p2651_p12 = pnand %p2649_p11, %p2646_p10 }
  0x39   : > { %2654 = shalt.err (!%p2651_p12)
}
  0x3a   : > { %s2655_s2 = scalar_lea.vmem %s3399_s19, 256  ;;  %p2663_p4 = scmp.lt.s32.totalorder %s3399_s19, %s3399_s19 }
  0x3b   : > { %p2656_p13 = scmp.ne.s32.totalorder %s3399_s19, %s2655_s2  ;;  %p2664_p5 = scmp.lt.s32.totalorder %s2655_s2, %s2655_s2 }
  0x3d   : > { %p2658_p0 = pnand %p2656_p13, %p3422_p8  ;;  %p2665_p7 = por %p2664_p5, %p2663_p4 }
  0x3f   : > { %p2659_p2 = pneg %p2658_p0 }
  0x41   : > { %p2666_p9 = pnand %p2665_p7, %p2659_p2 }
  0x43   : > { %2669 = shalt.err (!%p2666_p9)
}
  0x44   : > { %s3243_s17 = smov 64   ;;  %s3244_s27 = smov 4  }
  0x45   : > { %2451 = dma.hbm_to_vmem [thread:$0]  (!%p3406_p6), %s4154_s3, 256, %s3399_s19, [#allocation9], %s3243_s17, %s3243_s17, %s3244_s27  }
  0x46   : > { %s4156_s5 = sld [smem:[#allocation49_spill]] }
  0x4c   : > { %s2670_s2 = scalar_lea.hbm %s4156_s5, 256 }
  0x4d   : > { %p2671_p5 = scmp.ne.s32.totalorder %s4156_s5, %s2670_s2  ;;  %p2677_p12 = scmp.lt.u32.totalorder %s2670_s2, %s4156_s5 }
  0x4f   : > { %p2673_p10 = pnand %p2671_p5, %p3422_p8 }
  0x51   : > { %p2674_p11 = pneg %p2673_p10 }
  0x53   : > { %p2679_p13 = pnand %p2677_p12, %p2674_p11 }
  0x55   : > { %2682 = shalt.err (!%p2679_p13)
}
  0x56   : > { %s2683_s19 = scalar_lea.vmem %s3410_s21, 256  ;;  %p2691_p7 = scmp.lt.s32.totalorder %s3410_s21, %s3410_s21 }
  0x57   : > { %p2684_p0 = scmp.ne.s32.totalorder %s3410_s21, %s2683_s19  ;;  %p2692_p9 = scmp.lt.s32.totalorder %s2683_s19, %s2683_s19 }
  0x59   : > { %p2686_p2 = pnand %p2684_p0, %p3422_p8  ;;  %p2693_p5 = por %p2692_p9, %p2691_p7 }
  0x5b   : > { %p2687_p4 = pneg %p2686_p2 }
  0x5d   : > { %p2694_p10 = pnand %p2693_p5, %p2687_p4 }
  0x5f   : > { %2697 = shalt.err (!%p2694_p10)
}
  0x60   : > { %2457 = dma.hbm_to_vmem [thread:$0]  (!%p3406_p6), %s4156_s5, 256, %s3410_s21, [#allocation12], %s3243_s17, %s3243_s17, %s3244_s27  }
  0x61   : > { %s4157_s7 = sld [smem:[#allocation51_spill]] }
  0x67   : > { %s2698_s30 = scalar_lea.hbm %s4157_s7, 256 }
  0x68   : > { %p2699_p11 = scmp.ne.s32.totalorder %s4157_s7, %s2698_s30  ;;  %p2705_p0 = scmp.lt.u32.totalorder %s2698_s30, %s4157_s7 }
  0x6a   : > { %p2701_p12 = pnand %p2699_p11, %p3422_p8 }
  0x6c   : > { %p2702_p13 = pneg %p2701_p12 }
  0x6e   : > { %p2707_p2 = pnand %p2705_p0, %p2702_p13 }
  0x70   : > { %2710 = shalt.err (!%p2707_p2)
}
  0x71   : > { %s2711_s19 = scalar_lea.vmem %s525_s23, 256  ;;  %p2719_p5 = scmp.lt.s32.totalorder %s525_s23, %s525_s23 }
  0x72   : > { %p2712_p4 = scmp.ne.s32.totalorder %s525_s23, %s2711_s19  ;;  %p2720_p10 = scmp.lt.s32.totalorder %s2711_s19, %s2711_s19 }
  0x74   : > { %p2714_p7 = pnand %p2712_p4, %p3422_p8  ;;  %p2721_p1 = por %p2720_p10, %p2719_p5 }
  0x76   : > { %p2715_p9 = pneg %p2714_p7 }
  0x78   : > { %p2722_p3 = pnand %p2721_p1, %p2715_p9 }
  0x7a   : > { %2725 = shalt.err (!%p2722_p3)
}
  0x7b   : > { %2463 = dma.hbm_to_vmem [thread:$0]  (!%p3406_p6), %s4157_s7, 256, %s525_s23, [#allocation15], %s3243_s17, %s3243_s17, %s3244_s27  }
  0x7c   : > { %s3245_s10 = smov [#allocation17]   ;;  %s3246_s14 = smov [#allocation20]  }
  0x7d   : > { %s549_s12 = sshll.u32 %s3245_s10, 4  ;;  %s570_s30 = sshll.u32 %s3246_s14, 4  ;;  %s550_s12 = int_to_ptr.vmem [resolvable:$true] %s549_s12  ;;  %s571_s30 = int_to_ptr.vmem [resolvable:$true] %s570_s30 }
  0x7e   : > { %s4158_s9 = sld [smem:[#allocation53_spill]] }
  0x84   : > { %s2726_s22 = scalar_lea.hbm %s4158_s9, 16 }
  0x85   : > { %p2727_p1 = scmp.ne.s32.totalorder %s4158_s9, %s2726_s22  ;;  %p2733_p12 = scmp.lt.u32.totalorder %s2726_s22, %s4158_s9 }
  0x87   : > { %p2729_p3 = pnand %p2727_p1, %p3422_p8 }
  0x89   : > { %p2730_p11 = pneg %p2729_p3 }
  0x8b   : > { %p2735_p13 = pnand %p2733_p12, %p2730_p11 }
  0x8d   : > { %2738 = shalt.err (!%p2735_p13)
}
  0x8e   : > { %s2739_s23 = scalar_lea.vmem %s550_s12, 16  ;;  %s2746_s8 = scalar_lea.vmem %s550_s12, 32 }
  0x8f   : > { %p2740_p0 = scmp.ne.s32.totalorder %s550_s12, %s2739_s23  ;;  %p2747_p7 = scmp.lt.s32.totalorder %s550_s12, %s550_s12 }
  0x90   : > { %p2748_p9 = scmp.lt.s32.totalorder %s2746_s8, %s2739_s23 }
  0x91   : > { %p2742_p2 = pnand %p2740_p0, %p3422_p8 }
  0x92   : > { %p2749_p5 = por %p2748_p9, %p2747_p7 }
  0x93   : > { %p2743_p4 = pneg %p2742_p2 }
  0x95   : > { %p2750_p10 = pnand %p2749_p5, %p2743_p4 }
  0x97   : > { %2753 = shalt.err (!%p2750_p10)
}
  0x98   : > { %2469 = dma.hbm_to_vmem [thread:$0]  (!%p3406_p6), %s4158_s9, 16, %s550_s12, [#allocation18]  }
  0x99   : > { %s4159_s11 = sld [smem:[#allocation55_spill]] }
  0x9f   : > { %s2754_s20 = scalar_lea.hbm %s4159_s11, 256 }
  0xa0   : > { %p2755_p1 = scmp.ne.s32.totalorder %s4159_s11, %s2754_s20  ;;  %p2761_p12 = scmp.lt.u32.totalorder %s2754_s20, %s4159_s11 }
  0xa2   : > { %p2757_p3 = pnand %p2755_p1, %p3422_p8 }
  0xa4   : > { %p2758_p11 = pneg %p2757_p3 }
  0xa6   : > { %p2763_p13 = pnand %p2761_p12, %p2758_p11 }
  0xa8   : > { %2766 = shalt.err (!%p2763_p13)
}
  0xa9   : > { %s2767_s23 = scalar_lea.vmem %s571_s30, 256  ;;  %p2775_p7 = scmp.lt.s32.totalorder %s571_s30, %s571_s30 }
  0xaa   : > { %p2768_p0 = scmp.ne.s32.totalorder %s571_s30, %s2767_s23  ;;  %p2776_p9 = scmp.lt.s32.totalorder %s2767_s23, %s2767_s23 }
  0xac   : > { %p2770_p2 = pnand %p2768_p0, %p3422_p8  ;;  %p2777_p5 = por %p2776_p9, %p2775_p7 }
  0xae   : > { %p2771_p4 = pneg %p2770_p2 }
  0xb0   : > { %p2778_p10 = pnand %p2777_p5, %p2771_p4 }
  0xb2   : > { %2781 = shalt.err (!%p2778_p10)
}
  0xb3   : > { %2475 = dma.hbm_to_vmem [thread:$0]  (!%p3406_p6), %s4159_s11, 256, %s571_s30, [#allocation21], %s3243_s17, %s3243_s17, %s3244_s27  }
  0xb4   : > { %s3247_s10 = smov [#allocation23]   ;;  %s3248_s3 = smov [#allocation26]  }
  0xb5   : > { %s594_s14 = sshll.u32 %s3247_s10, 4  ;;  %s619_s18 = sshll.u32 %s3248_s3, 4  ;;  %s595_s14 = int_to_ptr.vmem [resolvable:$true] %s594_s14  ;;  %s620_s18 = int_to_ptr.vmem [resolvable:$true] %s619_s18 }
  0xb6   : > { %s4160_s13 = sld [smem:[#allocation57_spill]] }
  0xbc   : > { %s2782_s2 = scalar_lea.hbm %s4160_s13, 1024 }
  0xbd   : > { %p2783_p1 = scmp.ne.s32.totalorder %s4160_s13, %s2782_s2  ;;  %p2789_p12 = scmp.lt.u32.totalorder %s2782_s2, %s4160_s13 }
  0xbf   : > { %p2785_p3 = pnand %p2783_p1, %p3422_p8 }
  0xc1   : > { %p2786_p11 = pneg %p2785_p3 }
  0xc3   : > { %p2791_p13 = pnand %p2789_p12, %p2786_p11 }
  0xc5   : > { %2794 = shalt.err (!%p2791_p13)
}
  0xc6   : > { %s2795_s30 = scalar_lea.vmem %s595_s14, 1024  ;;  %p2803_p7 = scmp.lt.s32.totalorder %s595_s14, %s595_s14 }
  0xc7   : > { %p2796_p0 = scmp.ne.s32.totalorder %s595_s14, %s2795_s30  ;;  %p2804_p9 = scmp.lt.s32.totalorder %s2795_s30, %s2795_s30 }
  0xc9   : > { %p2798_p2 = pnand %p2796_p0, %p3422_p8  ;;  %p2805_p5 = por %p2804_p9, %p2803_p7 }
  0xcb   : > { %p2799_p4 = pneg %p2798_p2 }
  0xcd   : > { %p2806_p10 = pnand %p2805_p5, %p2799_p4 }
  0xcf   : > { %2809 = shalt.err (!%p2806_p10)
}
  0xd0   : > { %2481 = dma.hbm_to_vmem [thread:$0]  (!%p3406_p6), %s4160_s13, 1024, %s595_s14, [#allocation24], %s3243_s17, %s3243_s17, %s3244_s27  }
  0xd1   : > { %s4161_s15 = sld [smem:[#allocation59_spill]] }
  0xd7   : > { %s2810_s22 = scalar_lea.hbm %s4161_s15, 16 }
  0xd8   : > { %p2811_p1 = scmp.ne.s32.totalorder %s4161_s15, %s2810_s22  ;;  %p2817_p12 = scmp.lt.u32.totalorder %s2810_s22, %s4161_s15 }
  0xda   : > { %p2813_p3 = pnand %p2811_p1, %p3422_p8 }
  0xdc   : > { %p2814_p11 = pneg %p2813_p3 }
  0xde   : > { %p2819_p13 = pnand %p2817_p12, %p2814_p11 }
  0xe0   : > { %2822 = shalt.err (!%p2819_p13)
}
  0xe1   : > { %s2823_s12 = scalar_lea.vmem %s620_s18, 16  ;;  %s2830_s17 = scalar_lea.vmem %s620_s18, 32 }
  0xe2   : > { %p2824_p0 = scmp.ne.s32.totalorder %s620_s18, %s2823_s12  ;;  %p2831_p7 = scmp.lt.s32.totalorder %s620_s18, %s620_s18 }
  0xe3   : > { %p2832_p9 = scmp.lt.s32.totalorder %s2830_s17, %s2823_s12 }
  0xe4   : > { %p2826_p2 = pnand %p2824_p0, %p3422_p8 }
  0xe5   : > { %p2833_p5 = por %p2832_p9, %p2831_p7 }
  0xe6   : > { %p2827_p4 = pneg %p2826_p2 }
  0xe8   : > { %p2834_p10 = pnand %p2833_p5, %p2827_p4 }
  0xea   : > { %2837 = shalt.err (!%p2834_p10)
}
  0xeb   : > { %2487 = dma.hbm_to_vmem [thread:$0]  (!%p3406_p6), %s4161_s15, 16, %s620_s18, [#allocation27]  }
  0xec   : > { %s2141_s30 = sadd.s32 4294967294, %s3238_s29   ;;  %s55_s8 = sadd.s32 1, %s3234_s28 }
  0xed   : > { %s64_s10 = sadd.s32 1, %s3226_s26  ;;  %p57_p1 = scmp.ge.s32.totalorder %s55_s8, 2 }
  0xee   : > { %p71_p3 = scmp.ne.s32.totalorder %s3226_s26, %s3222_s25  ;;  %p72_p11 = scmp.eq.s32.totalorder %s3238_s29, 0 }
  0xef   : > { %p77_p12 = scmp.ne.s32.totalorder %s3222_s25, %s3218_s24  ;;  %s4215_s8 = smov (%p57_p1, %s55_s8), 0 }
  0xf0   : > { %4162 = sst [smem:[#allocation43_spill]] %s4215_s8  ;;  %p3582_p13 = por %p72_p11, %p71_p3 }
  0xf1   : > { %p4164_p0 = scmp.eq.s32.totalorder %s3390_s0, 0  ;;  %s59_s20 = ssub.s32 %s3234_s28, %s4215_s8 }
  0xf2   : > { %p451_p4 = scmp.eq.s32.totalorder %s3390_s0, 1  ;;  %p62_p7 = scmp.eq.s32.totalorder %s59_s20, 0 }
  0xf3   : > { %p3588_p2 = por %p4164_p0, %p77_p12  ;;  %p457_p9 = scmp.eq.s32.totalorder %s2141_s30, 1 }
  0xf4   : > { %p3595_p5 = por %p451_p4, %p71_p3  ;;  %p2519_p10 = scmp.lt.s32.totalorder %s3238_s29, 2 }
  0xf5   : > { %s4165_s18 = scalar_select %p3588_p2, 1, 0 }
  0xf6   : > { %s4166_s22 = scalar_select %p3595_p5, 1, 0 }
  0xf7   : > { %s3601_s2 = scalar_select %p62_p7, %s3226_s26, %s64_s10  }
  0xf8   : > { %p3603_p1 = por %p457_p9, %p77_p12  ;;  %s4114_s21 = sand.u32 1, %s3226_s26  }
  0xf9   : > { %s3610_s23 = sshll.u32 %s4114_s21, 3  ;;  %s3613_s12 = sshll.u32 %s3234_s28, 7 }
  0xfa   : > { %s4167_s19 = scalar_select %p3603_p1, 1, 0 }
  0xfb   : > { %p3617_p3 = pnand %p2519_p10, %p3582_p13  ;;  %s660_s27 = sand.u32 1, %s3238_s29  }
  0xfc   : > { %s4169_s10 = sld [smem:[#allocation45_spill]]  ;;  %s664_s21 = scalar_lea.vmem [#allocation5], %s3610_s23 }
  0xfd   : > { %s4168_s17 = scalar_select %p3617_p3, 1, 0 }
  0xfe   : > { %s671_s5 = sshll.u32 %s664_s21, 4  ;;  %s3249_s3 = smov [#allocation10]   ;;  %s3629_s5 = int_to_ptr.vmem [resolvable:$true] %s671_s5 }
  0xff   : > { %s3631_s7 = sshll.u32 %s3249_s3, 4  ;;  %s3633_s9 = scalar_lea.sflag [#allocation6], %s660_s27  ;;  %s491_s7 = int_to_ptr.vmem [resolvable:$true] %s3631_s7 }
 0x100   : > { %p3639_p12 = pneg %p3617_p3 }
 0x102   : > { %s3626_s20 = scalar_lea.hbm %s4169_s10, %s3613_s12  ;;  %s2843_s13 = scalar_lea.hbm %s4169_s10, 256 }
 0x103   : > { %s2838_s11 = scalar_lea.hbm %s3626_s20, 128  ;;  %p2844_p4 = scmp.lt.u32.totalorder %s3626_s20, %s4169_s10 }
 0x104   : > { %p2839_p11 = scmp.ne.s32.totalorder %s3626_s20, %s2838_s11  ;;  %p2845_p7 = scmp.lt.u32.totalorder %s2843_s13, %s2838_s11 }
 0x105   : > { %s4170_s14 = scalar_select %p3639_p12, 1, 0 }
 0x106   : > { %p2841_p13 = pnand %p3639_p12, %p2839_p11  ;;  %p2846_p9 = por %p2845_p7, %p2844_p4 }
 0x107   : > { %p2847_p10 = scmp.lt.u32.totalorder %s2838_s11, %s3626_s20 }
 0x108   : > { %p2842_p0 = pneg %p2841_p13 }
 0x109   : > { %p2848_p1 = por %p2847_p10, %p2846_p9 }
 0x10b   : > { %p2849_p5 = pnand %p2848_p1, %p2842_p0 }
 0x10d   : > { %2852 = shalt.err (!%p2849_p5)
}
 0x10e   : > { %s2853_s27 = scalar_lea.vmem %s3629_s5, 128  ;;  %s3250_s30 = smov [#allocation5]  }
 0x10f   : > { %p2854_p11 = scmp.ne.s32.totalorder %s3629_s5, %s2853_s27  ;;  %s2858_s21 = sshll.u32 %s3250_s30, 4  ;;  %s2859_s21 = int_to_ptr.vmem [resolvable:$false] %s2858_s21 }
 0x110   : > { %s2860_s15 = scalar_lea.vmem %s2859_s21, 256  ;;  %p2861_p6 = scmp.lt.s32.totalorder %s3629_s5, %s2859_s21 }
 0x111   : > { %p2856_p13 = pnand %p2854_p11, %p3639_p12  ;;  %p2862_p8 = scmp.lt.s32.totalorder %s2860_s15, %s2853_s27 }
 0x113   : > { %p2857_p2 = pneg %p2856_p13  ;;  %p2863_p4 = por %p2862_p8, %p2861_p6 }
 0x115   : > { %p2864_p7 = pnand %p2863_p4, %p2857_p2 }
 0x117   : > { %2867 = shalt.err (!%p2864_p7)
}
 0x118   : > { %2497 = dma.hbm_to_vmem [thread:$0]  (!%p3617_p3), %s3626_s20, 128, %s3629_s5, %s3633_s9  }
 0x119   : > { %s4171_s4 = sld [smem:[#allocation48_spill]]  ;;  %p4172_p6 = scmp.ne.s32.totalorder %s4155_s16, 0 }
 0x11f   : > { %s2868_s3 = scalar_lea.hbm %s4171_s4, 16 }
 0x120   : > { %p2869_p5 = scmp.ne.s32.totalorder %s4171_s4, %s2868_s3  ;;  %p2875_p1 = scmp.lt.u32.totalorder %s2868_s3, %s4171_s4 }
 0x122   : > { %p2871_p8 = pnand %p2869_p5, %p4172_p6 }
 0x124   : > { %p2872_p2 = pneg %p2871_p8 }
 0x126   : > { %p2877_p0 = pnand %p2875_p1, %p2872_p2 }
 0x128   : > { %2880 = shalt.err (!%p2877_p0)
}
 0x129   : > { %s2881_s15 = scalar_lea.vmem %s491_s7, 16  ;;  %s2888_s5 = scalar_lea.vmem %s491_s7, 32 }
 0x12a   : > { %p2882_p9 = scmp.ne.s32.totalorder %s491_s7, %s2881_s15  ;;  %p2889_p13 = scmp.lt.s32.totalorder %s491_s7, %s491_s7 }
 0x12b   : > { %p2890_p4 = scmp.lt.s32.totalorder %s2888_s5, %s2881_s15 }
 0x12c   : > { %p2884_p10 = pnand %p2882_p9, %p4172_p6 }
 0x12d   : > { %p2891_p7 = por %p2890_p4, %p2889_p13 }
 0x12e   : > { %p2885_p11 = pneg %p2884_p10 }
 0x130   : > { %p2892_p3 = pnand %p2891_p7, %p2885_p11 }
 0x132   : > { %2895 = shalt.err (!%p2892_p3)
}
 0x133   : > { %p4173_p5 = scmp.ne.s32.totalorder %s4153_s1, 0  ;;  %s3251_s11 = smov [#allocation13]  }
 0x134   : > { %s514_s13 = sshll.u32 %s3251_s11, 4  ;;  %s3252_s3 = smov [#allocation16]   ;;  %s515_s13 = int_to_ptr.vmem [resolvable:$true] %s514_s13 }
 0x135   : > { %2454 = dma.hbm_to_vmem [thread:$0]  (!%p4173_p5), %s4171_s4, 16, %s491_s7, [#allocation9]  }
 0x136   : > { %s538_s30 = sshll.u32 %s3252_s3, 4  ;;  %s4174_s6 = sld [smem:[#allocation50_spill]]  ;;  %s539_s30 = int_to_ptr.vmem [resolvable:$true] %s538_s30 }
 0x13c   : > { %s2896_s8 = scalar_lea.hbm %s4174_s6, 16 }
 0x13d   : > { %p2897_p3 = scmp.ne.s32.totalorder %s4174_s6, %s2896_s8  ;;  %p2903_p1 = scmp.lt.u32.totalorder %s2896_s8, %s4174_s6 }
 0x13f   : > { %p2899_p8 = pnand %p2897_p3, %p4172_p6 }
 0x141   : > { %p2900_p2 = pneg %p2899_p8 }
 0x143   : > { %p2905_p0 = pnand %p2903_p1, %p2900_p2 }
 0x145   : > { %2908 = shalt.err (!%p2905_p0)
}
 0x146   : > { %s2909_s7 = scalar_lea.vmem %s515_s13, 16  ;;  %s2916_s20 = scalar_lea.vmem %s515_s13, 32 }
 0x147   : > { %p2910_p9 = scmp.ne.s32.totalorder %s515_s13, %s2909_s7  ;;  %p2917_p13 = scmp.lt.s32.totalorder %s515_s13, %s515_s13 }
 0x148   : > { %p2918_p4 = scmp.lt.s32.totalorder %s2916_s20, %s2909_s7 }
 0x149   : > { %p2912_p10 = pnand %p2910_p9, %p4172_p6 }
 0x14a   : > { %p2919_p7 = por %p2918_p4, %p2917_p13 }
 0x14b   : > { %p2913_p11 = pneg %p2912_p10 }
 0x14d   : > { %p2920_p12 = pnand %p2919_p7, %p2913_p11 }
 0x14f   : > { %2923 = shalt.err (!%p2920_p12)
}
 0x150   : > { %2460 = dma.hbm_to_vmem [thread:$0]  (!%p4173_p5), %s4174_s6, 16, %s515_s13, [#allocation12]  }
 0x151   : > { %s4175_s27 = sld [smem:[#allocation52_spill]] }
 0x157   : > { %s4176_s21 = smov %s4175_s27  ;;  %s2924_s15 = scalar_lea.hbm %s4175_s27, 16 }
 0x158   : > { %p2925_p3 = scmp.ne.s32.totalorder %s4176_s21, %s2924_s15  ;;  %p2931_p12 = scmp.lt.u32.totalorder %s2924_s15, %s4176_s21 }
 0x15a   : > { %p2927_p8 = pnand %p2925_p3, %p4172_p6 }
 0x15c   : > { %p2928_p2 = pneg %p2927_p8 }
 0x15e   : > { %p2933_p1 = pnand %p2931_p12, %p2928_p2 }
 0x160   : > { %2936 = shalt.err (!%p2933_p1)
}
 0x161   : > { %s2937_s11 = scalar_lea.vmem %s539_s30, 16  ;;  %s2944_s13 = scalar_lea.vmem %s539_s30, 32 }
 0x162   : > { %p2938_p0 = scmp.ne.s32.totalorder %s539_s30, %s2937_s11  ;;  %p2945_p11 = scmp.lt.s32.totalorder %s539_s30, %s539_s30 }
 0x163   : > { %p2946_p13 = scmp.lt.s32.totalorder %s2944_s13, %s2937_s11 }
 0x164   : > { %p2940_p9 = pnand %p2938_p0, %p4172_p6 }
 0x165   : > { %p2947_p4 = por %p2946_p13, %p2945_p11 }
 0x166   : > { %p2941_p10 = pneg %p2940_p9 }
 0x168   : > { %p2948_p7 = pnand %p2947_p4, %p2941_p10 }
 0x16a   : > { %2951 = shalt.err (!%p2948_p7)
}
 0x16b   : > { %2466 = dma.hbm_to_vmem [thread:$0]  (!%p4173_p5), %s4176_s21, 16, %s539_s30, [#allocation15]  }
 0x16c   : > { %s3253_s8 = smov [#allocation19]   ;;  %s3254_s15 = smov [#allocation22]  }
 0x16d   : > { %s560_s27 = sshll.u32 %s3253_s8, 4  ;;  %s584_s5 = sshll.u32 %s3254_s15, 4  ;;  %s561_s27 = int_to_ptr.vmem [resolvable:$true] %s560_s27  ;;  %s585_s5 = int_to_ptr.vmem [resolvable:$true] %s584_s5 }
 0x16e   : > { %s4177_s20 = sld [smem:[#allocation54_spill]] }
 0x174   : > { %s2952_s4 = scalar_lea.hbm %s4177_s20, 16 }
 0x175   : > { %p2953_p3 = scmp.ne.s32.totalorder %s4177_s20, %s2952_s4  ;;  %p2959_p12 = scmp.lt.u32.totalorder %s2952_s4, %s4177_s20 }
 0x177   : > { %p2955_p8 = pnand %p2953_p3, %p4172_p6 }
 0x179   : > { %p2956_p2 = pneg %p2955_p8 }
 0x17b   : > { %p2961_p1 = pnand %p2959_p12, %p2956_p2 }
 0x17d   : > { %2964 = shalt.err (!%p2961_p1)
}
 0x17e   : > { %s2965_s30 = scalar_lea.vmem %s561_s27, 16  ;;  %s2972_s28 = scalar_lea.vmem %s561_s27, 32 }
 0x17f   : > { %p2966_p0 = scmp.ne.s32.totalorder %s561_s27, %s2965_s30  ;;  %p2973_p11 = scmp.lt.s32.totalorder %s561_s27, %s561_s27 }
 0x180   : > { %p2974_p13 = scmp.lt.s32.totalorder %s2972_s28, %s2965_s30 }
 0x181   : > { %p2968_p9 = pnand %p2966_p0, %p4172_p6 }
 0x182   : > { %p2975_p4 = por %p2974_p13, %p2973_p11 }
 0x183   : > { %p2969_p10 = pneg %p2968_p9 }
 0x185   : > { %p2976_p7 = pnand %p2975_p4, %p2969_p10 }
 0x187   : > { %2979 = shalt.err (!%p2976_p7)
}
 0x188   : > { %2472 = dma.hbm_to_vmem [thread:$0]  (!%p4173_p5), %s4177_s20, 16, %s561_s27, [#allocation18]  }
 0x189   : > { %s4178_s10 = sld [smem:[#allocation56_spill]] }
 0x18f   : > { %s2980_s7 = scalar_lea.hbm %s4178_s10, 16 }
 0x190   : > { %p2981_p3 = scmp.ne.s32.totalorder %s4178_s10, %s2980_s7  ;;  %p2987_p12 = scmp.lt.u32.totalorder %s2980_s7, %s4178_s10 }
 0x192   : > { %p2983_p8 = pnand %p2981_p3, %p4172_p6 }
 0x194   : > { %p2984_p2 = pneg %p2983_p8 }
 0x196   : > { %p2989_p1 = pnand %p2987_p12, %p2984_p2 }
 0x198   : > { %2992 = shalt.err (!%p2989_p1)
}
 0x199   : > { %s2993_s28 = scalar_lea.vmem %s585_s5, 16  ;;  %s3000_s27 = scalar_lea.vmem %s585_s5, 32 }
 0x19a   : > { %p2994_p0 = scmp.ne.s32.totalorder %s585_s5, %s2993_s28  ;;  %p3001_p11 = scmp.lt.s32.totalorder %s585_s5, %s585_s5 }
 0x19b   : > { %p3002_p13 = scmp.lt.s32.totalorder %s3000_s27, %s2993_s28 }
 0x19c   : > { %p2996_p9 = pnand %p2994_p0, %p4172_p6 }
 0x19d   : > { %p3003_p4 = por %p3002_p13, %p3001_p11 }
 0x19e   : > { %p2997_p10 = pneg %p2996_p9 }
 0x1a0   : > { %p3004_p7 = pnand %p3003_p4, %p2997_p10 }
 0x1a2   : > { %3007 = shalt.err (!%p3004_p7)
}
 0x1a3   : > { %2478 = dma.hbm_to_vmem [thread:$0]  (!%p4173_p5), %s4178_s10, 16, %s585_s5, [#allocation21]  }
 0x1a4   : > { %s3255_s4 = smov [#allocation25]   ;;  %s3256_s7 = smov [#allocation28]  }
 0x1a5   : > { %s608_s6 = sshll.u32 %s3255_s4, 4  ;;  %s630_s11 = sshll.u32 %s3256_s7, 4  ;;  %s609_s6 = int_to_ptr.vmem [resolvable:$true] %s608_s6  ;;  %s631_s11 = int_to_ptr.vmem [resolvable:$true] %s630_s11 }
 0x1a6   : > { %s4179_s30 = sld [smem:[#allocation58_spill]] }
 0x1ac   : > { %s3008_s20 = scalar_lea.hbm %s4179_s30, 16 }
 0x1ad   : > { %p3009_p3 = scmp.ne.s32.totalorder %s4179_s30, %s3008_s20  ;;  %p3015_p12 = scmp.lt.u32.totalorder %s3008_s20, %s4179_s30 }
 0x1af   : > { %p3011_p8 = pnand %p3009_p3, %p4172_p6 }
 0x1b1   : > { %p3012_p2 = pneg %p3011_p8 }
 0x1b3   : > { %p3017_p1 = pnand %p3015_p12, %p3012_p2 }
 0x1b5   : > { %3020 = shalt.err (!%p3017_p1)
}
 0x1b6   : > { %s3021_s5 = scalar_lea.vmem %s609_s6, 16  ;;  %s3028_s15 = scalar_lea.vmem %s609_s6, 32 }
 0x1b7   : > { %p3022_p0 = scmp.ne.s32.totalorder %s609_s6, %s3021_s5  ;;  %p3029_p11 = scmp.lt.s32.totalorder %s609_s6, %s609_s6 }
 0x1b8   : > { %p3030_p13 = scmp.lt.s32.totalorder %s3028_s15, %s3021_s5 }
 0x1b9   : > { %p3024_p9 = pnand %p3022_p0, %p4172_p6 }
 0x1ba   : > { %p3031_p4 = por %p3030_p13, %p3029_p11 }
 0x1bb   : > { %p3025_p10 = pneg %p3024_p9 }
 0x1bd   : > { %p3032_p7 = pnand %p3031_p4, %p3025_p10 }
 0x1bf   : > { %3035 = shalt.err (!%p3032_p7)
}
 0x1c0   : > { %2484 = dma.hbm_to_vmem [thread:$0]  (!%p4173_p5), %s4179_s30, 16, %s609_s6, [#allocation24]  }
 0x1c1   : > { %s4180_s13 = sld [smem:[#allocation60_spill]] }
 0x1c7   : > { %s3036_s3 = scalar_lea.hbm %s4180_s13, 16 }
 0x1c8   : > { %p3037_p3 = scmp.ne.s32.totalorder %s4180_s13, %s3036_s3  ;;  %p3043_p12 = scmp.lt.u32.totalorder %s3036_s3, %s4180_s13 }
 0x1ca   : > { %p3039_p8 = pnand %p3037_p3, %p4172_p6 }
 0x1cc   : > { %p3040_p2 = pneg %p3039_p8 }
 0x1ce   : > { %p3045_p1 = pnand %p3043_p12, %p3040_p2 }
 0x1d0   : > { %3048 = shalt.err (!%p3045_p1)
}
 0x1d1   : > { %s3049_s15 = scalar_lea.vmem %s631_s11, 16  ;;  %s3056_s6 = scalar_lea.vmem %s631_s11, 32 }
 0x1d2   : > { %p3050_p0 = scmp.ne.s32.totalorder %s631_s11, %s3049_s15  ;;  %p3057_p11 = scmp.lt.s32.totalorder %s631_s11, %s631_s11 }
 0x1d3   : > { %p3058_p13 = scmp.lt.s32.totalorder %s3056_s6, %s3049_s15 }
 0x1d4   : > { %p3052_p9 = pnand %p3050_p0, %p4172_p6 }
 0x1d5   : > { %p3059_p4 = por %p3058_p13, %p3057_p11 }
 0x1d6   : > { %p3053_p10 = pneg %p3052_p9 }
 0x1d8   : > { %p3060_p7 = pnand %p3059_p4, %p3053_p10 }
 0x1da   : > { %3063 = shalt.err (!%p3060_p7)
}
 0x1db   : > { %2490 = dma.hbm_to_vmem [thread:$0]  (!%p4173_p5), %s4180_s13, 16, %s631_s11, [#allocation27]  }
 0x1dc   : > { %s4181_s20 = sld [smem:[#allocation44_spill]]  ;;  %s645_s28 = scalar_lea.vmem [#allocation2], %s3610_s23 }
 0x1dd   : > { %s653_s1 = sshll.u32 %s645_s28, 4  ;;  %s4182_s5 = sld [smem:[#allocation46_spill]]  ;;  %s3797_s1 = int_to_ptr.vmem [resolvable:$true] %s653_s1 }
 0x1de   : > { %s4183_s6 = sand.u32 1, %s3226_s26   ;;  %p4184_p5 = scmp.ne.s32.totalorder %s4170_s14, 0 }
 0x1df   : > { %s642_s11 = scalar_lea.sflag [#allocation3], %s4183_s6 }
 0x1e2   : > { %s3794_s3 = scalar_lea.hbm %s4181_s20, %s3613_s12  ;;  %s3069_s21 = scalar_lea.hbm %s4181_s20, 256 }
 0x1e3   : > { %s3803_s15 = scalar_lea.hbm %s4182_s5, %s3613_s12  ;;  %s3064_s4 = scalar_lea.hbm %s3794_s3, 128 }
 0x1e4   : > { %p3065_p6 = scmp.ne.s32.totalorder %s3794_s3, %s3064_s4  ;;  %p3070_p2 = scmp.lt.u32.totalorder %s3794_s3, %s4181_s20 }
 0x1e5   : > { %p3071_p12 = scmp.lt.u32.totalorder %s3069_s21, %s3064_s4  ;;  %p3073_p0 = scmp.lt.u32.totalorder %s3064_s4, %s3794_s3 }
 0x1e6   : > { %p3067_p3 = pnand %p3065_p6, %p4184_p5 }
 0x1e7   : > { %p3072_p1 = por %p3071_p12, %p3070_p2 }
 0x1e8   : > { %p3068_p8 = pneg %p3067_p3 }
 0x1e9   : > { %p3074_p9 = por %p3073_p0, %p3072_p1 }
 0x1eb   : > { %p3075_p10 = pnand %p3074_p9, %p3068_p8 }
 0x1ed   : > { %3078 = shalt.err (!%p3075_p10)
}
 0x1ee   : > { %s3079_s12 = scalar_lea.vmem %s3797_s1, 128  ;;  %s3257_s27 = smov [#allocation2]  }
 0x1ef   : > { %p3080_p11 = scmp.ne.s32.totalorder %s3797_s1, %s3079_s12  ;;  %s3084_s8 = sshll.u32 %s3257_s27, 4  ;;  %s3085_s8 = int_to_ptr.vmem [resolvable:$false] %s3084_s8 }
 0x1f0   : > { %s3086_s10 = scalar_lea.vmem %s3085_s8, 256  ;;  %p3087_p7 = scmp.lt.s32.totalorder %s3797_s1, %s3085_s8 }
 0x1f1   : > { %p3082_p13 = pnand %p3080_p11, %p4184_p5  ;;  %p3088_p6 = scmp.lt.s32.totalorder %s3086_s10, %s3079_s12 }
 0x1f3   : > { %p3083_p4 = pneg %p3082_p13  ;;  %p3089_p3 = por %p3088_p6, %p3087_p7 }
 0x1f5   : > { %p3090_p2 = pnand %p3089_p3, %p3083_p4 }
 0x1f7   : > { %3093 = shalt.err (!%p3090_p2)
}
 0x1f8   : > { %p4185_p8 = scmp.ne.s32.totalorder %s4168_s17, 0  ;;  %s682_s6 = scalar_lea.vmem [#allocation7], %s3610_s23 }
 0x1f9   : > { %s690_s4 = sshll.u32 %s682_s6, 4  ;;  %s3094_s7 = scalar_lea.hbm %s3803_s15, 128  ;;  %s691_s4 = int_to_ptr.vmem [resolvable:$true] %s690_s4 }
 0x1fa   : > { %2494 = dma.hbm_to_vmem [thread:$0]  (!%p4185_p8), %s3794_s3, 128, %s3797_s1, %s642_s11  }
 0x1fb   : > { %p3095_p12 = scmp.ne.s32.totalorder %s3803_s15, %s3094_s7  ;;  %s3099_s28 = scalar_lea.hbm %s4182_s5, 256 }
 0x1fc   : > { %p3100_p9 = scmp.lt.u32.totalorder %s3803_s15, %s4182_s5  ;;  %p3101_p10 = scmp.lt.u32.totalorder %s3099_s28, %s3094_s7 }
 0x1fd   : > { %p3097_p1 = pnand %p3095_p12, %p4184_p5  ;;  %p3103_p13 = scmp.lt.u32.totalorder %s3094_s7, %s3803_s15 }
 0x1fe   : > { %p3102_p11 = por %p3101_p10, %p3100_p9 }
 0x1ff   : > { %p3098_p0 = pneg %p3097_p1 }
 0x200   : > { %p3104_p4 = por %p3103_p13, %p3102_p11 }
 0x202   : > { %p3105_p7 = pnand %p3104_p4, %p3098_p0 }
 0x204   : > { %3108 = shalt.err (!%p3105_p7)
}
 0x205   : > { %s3109_s23 = scalar_lea.vmem %s691_s4, 128  ;;  %s3258_s3 = smov [#allocation7]  }
 0x206   : > { %p3110_p6 = scmp.ne.s32.totalorder %s691_s4, %s3109_s23  ;;  %s3114_s1 = sshll.u32 %s3258_s3, 4  ;;  %s3115_s1 = int_to_ptr.vmem [resolvable:$false] %s3114_s1 }
 0x207   : > { %s3116_s11 = scalar_lea.vmem %s3115_s1, 256  ;;  %p3117_p12 = scmp.lt.s32.totalorder %s691_s4, %s3115_s1 }
 0x208   : > { %p3112_p3 = pnand %p3110_p6, %p4184_p5  ;;  %p3118_p1 = scmp.lt.s32.totalorder %s3116_s11, %s3109_s23 }
 0x20a   : > { %p3113_p2 = pneg %p3112_p3  ;;  %p3119_p8 = por %p3118_p1, %p3117_p12 }
 0x20c   : > { %p3120_p9 = pnand %p3119_p8, %p3113_p2 }
 0x20e   : > { %3123 = shalt.err (!%p3120_p9)
}
 0x20f   : > { %p4186_p10 = scmp.ne.s32.totalorder %s4168_s17, 0  ;;  %s4187_s8 = sld [smem:[#allocation42_spill]] }
 0x211   : > { %2500 = dma.hbm_to_vmem [thread:$0]  (!%p4186_p10), %s3803_s15, 128, %s691_s4, %s3633_s9  }
 0x215   : > { %p4188_p0 = scmp.ne.s32.totalorder %s4187_s8, 0 }
 0x216   : > { %s3850_s14 = sand.u32 (!%p4188_p0), 1, %s3222_s25   ;;  %p4189_p5 = scmp.ne.s32.totalorder (!%p4188_p0), %s4165_s18, 0 }
 0x217   : > { %699 = sbr.rel (%p4188_p0) target bundleno = 4254 (0x109e), region = 88  ;;  %s3853_s10 = sshll.u32 (!%p4188_p0), %s3850_s14, 3 }
 0x218   : > { %s702_s6 = scalar_lea.sflag (!%p4188_p0), [#allocation3], %s3850_s14  ;;  %s705_s7 = scalar_lea.vmem (!%p4188_p0), [#allocation2], %s3853_s10 }
 0x21e   : > { %3177 = dma.done.wait (%p4189_p5), %s702_s6, 128  }
 0x21f   : > { %3179 = vsyncadd (%p4189_p5), %s702_s6, 4294967168  ;;  %s710_s9 = sand.u32 1, %s3390_s0   ;;  %s714_s15 = scalar_lea.vmem [#allocation5], %s3853_s10 }
 0x220   : > { %s711_s17 = scalar_lea.sflag [#allocation6], %s710_s9 }
 0x221   : > { %3181 = dma.done.wait (%p4189_p5), %s711_s17, 256  }
 0x222   : > { %3183 = vsyncadd (%p4189_p5), %s711_s17, 4294967040  ;;  %s723_s4 = scalar_lea.vmem [#allocation7], %s3853_s10  ;;  %p4190_p8 = scmp.eq.s32.totalorder %s3390_s0, 0 }
 0x224   : > { %3185 = dma.done.wait (%p4190_p8), [#allocation9], 272   ;;  %p4191_p11 = pmov %p4190_p8 }
 0x225   : > { %p4192_p13 = pmov %p4190_p8 }
 0x226   : > { %3187 = vsyncadd (%p4191_p11), [#allocation9], 4294967024 }
 0x227   : > { %3189 = dma.done.wait (%p4192_p13), [#allocation12], 272   ;;  %p4193_p4 = pmov %p4190_p8 }
 0x229   : > { %3191 = vsyncadd (%p4193_p4), [#allocation12], 4294967024  ;;  %p4194_p7 = pmov %p4193_p4 }
 0x22a   : > { %p4195_p6 = pmov %p4193_p4 }
 0x22b   : > { %3193 = dma.done.wait (%p4194_p7), [#allocation15], 272  }
 0x22c   : > { %3195 = vsyncadd (%p4195_p6), [#allocation15], 4294967024  ;;  %p4196_p3 = pmov %p4193_p4 }
 0x22e   : > { %3197 = dma.done.wait (%p4196_p3), [#allocation18], 32   ;;  %p4197_p2 = pmov %p4196_p3 }
 0x230   : > { %3199 = vsyncadd (%p4197_p2), [#allocation18], 4294967264  ;;  %p4198_p12 = pmov %p4197_p2 }
 0x231   : > { %p4199_p1 = pmov %p4197_p2 }
 0x232   : > { %3201 = dma.done.wait (%p4198_p12), [#allocation21], 272  }
 0x233   : > { %3203 = vsyncadd (%p4199_p1), [#allocation21], 4294967024  ;;  %p4200_p9 = pmov %p4199_p1 }
 0x234   : > { %p4201_p10 = pmov %p4199_p1 }
 0x235   : > { %3205 = dma.done.wait (%p4200_p9), [#allocation24], 1040  }
 0x236   : > { %3207 = vsyncadd (%p4201_p10), [#allocation24], 4294966256  ;;  %p4202_p0 = pmov %p4199_p1 }
 0x238   : > { %3209 = dma.done.wait (%p4202_p0), [#allocation27], 32   ;;  %p4203_p5 = pmov %p4202_p0 }
 0x239   : > { %v3259_v0 = vmov 0.0   ;;  %vm3260_vm0 = vmmov 0   ;;  %v2608_v1 = vld [vmem:[#allocation8] sm:$0xff]   ;;  %v2609_v2 = vld [vmem:[#allocation8 + $0x8] sm:$0xff]   ;;  %v3904_v3 = vld [vmem:[%s705_s7] sm:$0xff]  ;;  %vm871_vm1 = vcmask 261120  }
 0x23a   : > { %3211 = vsyncadd (%p4203_p5), [#allocation27], 4294967264  ;;  %2268 = vmatprep.subr.bf16.mxu0 %v3259_v0  ;;  %2272 = vmatprep.mubr.msk.bf16.mxu0 %vm3260_vm0, %v3259_v0  ;;  %v2610_v4 = vld [vmem:[#allocation11] sm:$0xff]   ;;  %v846_v5 = vpack.c.bf16 %v3904_v3, %v3904_v3  ;;  %v2611_v6 = vld [vmem:[#allocation11 + $0x8] sm:$0xff]   ;;  %vm988_vm2 = vcmask 64512   ;;  %s3261_s0 = smov 120  }
 0x23b   : > { %2290 = vmatprep.subr.bf16.mxu1 %v3259_v0  ;;  %2292 = vmatprep.mubr.msk.bf16.mxu1 %vm3260_vm0, %v3259_v0  ;;  %v842_v7 = vld [vmem:[%s714_s15] sm:$0xff]  ;;  %v2184_v13 = vld [vmem:[#allocation10] ss:$0 sm:$0xff]  ;;  %s3262_s18 = smov 96   ;;  %vm1053_vm3 = vcmask 1043456   ;;  %s3263_s16 = smov 88  }
 0x23c   : > { %2269 = vmatpush3.bf16.msra.mxu0 %v2608_v1  ;;  %v847_v8 = vpack.c.bf16 %v842_v7, %v842_v7  ;;  %v2188_v14 = vld [vmem:[#allocation13] ss:$0 sm:$0xff]  ;;  %v843_v28 = vld [vmem:[%s723_s4] sm:$0xff]  ;;  %s3264_s21 = smov 112   ;;  %v985_v59 = vld [vmem:[#allocation14 + $0x4] sm:$0xf] }
 0x23d   : > { %2270 = vmatprep.subr.bf16.mxu0 %v3259_v0  ;;  %v2183_v29 = vadd.f32 -1.0, %v843_v28  ;;  %v1214_v60 = vsel %vm1053_vm3, %v985_v59, 0  ;;  %s3265_s28 = smov 80   ;;  %s3266_s12 = smov 104  }
 0x23e   : > { %s3267_s27 = smov 72   ;;  %s4204_s23 = sld [smem:[#allocation40_spill]] }
 0x23f   : > { %v3940_v30 = vmul.f32 1e+09, %v2183_v29  ;;  %s839_s1 = scalar_lea.vmem [#allocation29], %s3853_s10  ;;  %s4205_s7 = sld [smem:[#allocation61_spill]] }
 0x240   : > { %2271 = vmatpush3.bf16.msra.mxu0 %v2609_v2  ;;  %v984_v2 = vld [vmem:[#allocation14] sm:$0xf]  ;;  %s1883_s11 = sshll.u32 %s839_s1, 4  ;;  %s1869_s17 = scalar_lea.sflag [#allocation4], %s3850_s14  ;;  %s4036_s11 = int_to_ptr.vmem [resolvable:$true] %s1883_s11 }
 0x241   : > { %2276 = vmatprep.subr.bf16.mxu0 %v3259_v0  ;;  %s3124_s15 = scalar_lea.vmem %s4036_s11, 128  ;;  %p4206_p11 = scmp.ne.s32.totalorder %s4166_s22, 0 }
 0x242   : > { %p3125_p8 = scmp.ne.s32.totalorder %s4036_s11, %s3124_s15  ;;  %s3268_s10 = smov [#allocation29]  }
 0x243   : > { %2273 = vmatmul.mubr.msk.bf16.vlgmr.msra.gmra.mrb[0].mxu0 %vm871_vm1, %v846_v5  ;;  %s3128_s4 = sshll.u32 %s3268_s10, 4  ;;  %s3129_s4 = int_to_ptr.vmem [resolvable:$false] %s3128_s4 }
 0x244   : > { %2277 = vmatpush3.bf16.msra.mxu0 %v2610_v4  ;;  %2280 = vmatprep.mubr.msk.bf16.mxu0 %vm3260_vm0, %v3259_v0  ;;  %s2223_s3 = sshll.u32 %s4204_s23, 7  ;;  %p3126_p13 = pnand %p3125_p8, %p4206_p11 }
 0x245   : > { %2278 = vmatprep.subr.bf16.mxu0 %v3259_v0  ;;  %s4034_s9 = scalar_lea.hbm %s4205_s7, %s2223_s3  ;;  %p3131_p7 = scmp.lt.s32.totalorder %s4036_s11, %s3129_s4 }
 0x246   : > { %p3127_p4 = pneg %p3126_p13 }
 0x248   : > { %2279 = vmatpush3.bf16.msra.mxu0 %v2611_v6  ;;  %v1260_v6 = vsel %vm1053_vm3, %v984_v2, 0 }
 0x249   : > { %2284 = vmatprep.subr.bf16.mxu0 %v3259_v0 }
 0x24b   : > { %2281 = vmatmul.mubr.msk.bf16.vlgmr.msra.gmra.mrb[4].mxu0 %vm871_vm1, %v847_v8 }
 0x24c   : > { %2286 = vmatprep.mubr.msk.bf16.mxu0 %vm3260_vm0, %v3259_v0 }
 0x316   : > { %v909_v9 = vpop.f32.mrb[0].mxu0 }
 0x317   : > { %v2274_v10 = vpop.f32.mrb[1].mxu0  ;;  %v910_v15 = vadd.f32 %v2184_v13, %v909_v9 }
 0x318   : > { %v912_v11 = vpop.f32.mrb[2].mxu0 }
 0x319   : > { %v2275_v12 = vpop.f32.mrb[3].mxu0  ;;  %v915_v20 = vmul.f32 0.35355338, %v910_v15 }
 0x31b   : > { %v3925_v24 = vpack.c.bf16 %v915_v20, %v915_v20 }
 0x31e   : > { %v976_v16 = vpop.f32.mrb[4].mxu0 }
 0x31f   : > { %v977_v17 = vadd.f32 %v2188_v14, %v976_v16  ;;  %v2282_v18 = vpop.f32.mrb[5].mxu0 }
 0x320   : > { %v979_v19 = vpop.f32.mrb[6].mxu0 }
 0x321   : > { %v3920_v21 = vpack.c.bf16 %v977_v17, %v977_v17  ;;  %v2283_v22 = vpop.f32.mrb[7].mxu0 }
 0x323   : > { %1101 = vrot.lane.b32.xlu0 %v3920_v21, %s3261_s0  ;;  %v993_v23 = vsel %vm988_vm2, %v3920_v21, 0 }
 0x324   : > { %2285 = vmatpush3.bf16.xpose.msra.mxu0 %v993_v23 }
 0x325   : > { %2296 = vmatprep.subr.bf16.mxu0 %v3259_v0 }
 0x327   : > { %1099 = vrot.lane.b32.xlu0 %v3925_v24, %s3261_s0  ;;  %s3130_s0 = scalar_lea.vmem %s3129_s4, 256 }
 0x328   : > { %p3132_p6 = scmp.lt.s32.totalorder %s3130_s0, %s3124_s15 }
 0x32a   : > { %p3133_p3 = por %p3132_p6, %p3131_p7 }
 0x32b   : > { %2287 = vmatmul.mubr.msk.bf16.vlgmr.msra.gmra.mrb[8].mxu0 %vm988_vm2, %v3925_v24 }
 0x32c   : > { %2298 = vmatprep.mubr.msk.bf16.mxu0 %vm3260_vm0, %v3259_v0  ;;  %p3134_p2 = pnand %p3133_p3, %p3127_p4 }
 0x395   : > { %v1102_v25 = vpop.permute.xlu0 %1101 }
 0x396   : > { %v1107_v26 = vsel %vm988_vm2, %v1102_v25, 0 }
 0x397   : > { %2297 = vmatpush3.bf16.xpose.msra.mxu0 %v1107_v26 }
 0x398   : > { %2308 = vmatprep.subr.bf16.mxu0 %v3259_v0 }
 0x399   : > { %v1100_v27 = vpop.permute.xlu0 %1099 }
 0x39e   : > { %2299 = vmatmul.mubr.msk.bf16.vlgmr.msra.gmra.mrb[12].mxu0 %vm988_vm2, %v1100_v27 }
 0x39f   : > { %2310 = vmatprep.mubr.msk.bf16.mxu0 %vm3260_vm0, %v3259_v0  ;;  %2309 = vmatpush3.bf16.msra.mxu0 %v1214_v60 }
 0x3a0   : > { %2320 = vmatprep.subr.bf16.mxu0 %v3259_v0 }
 0x3fe   : > { %v1029_v31 = vpop.f32.mrb[8].mxu0 }
 0x3ff   : > { %v1030_v32 = vadd.f32 %v1029_v31, %v3940_v30  ;;  %v2288_v33 = vpop.f32.mrb[9].mxu0 }
 0x400   : > { %v1032_v34 = vpop.f32.mrb[10].mxu0 }
 0x401   : > { %v2289_v35 = vpop.f32.mrb[11].mxu0  ;;  %v1035_v36 = vsel %vm988_vm2, %v1030_v32, -inf }
 0x402   : > { %1036 = vmax.xlane.f32.xlu1 %v1035_v36 }
 0x471   : > { %v1143_v37 = vpop.f32.mrb[12].mxu0 }
 0x472   : > { %v1144_v38 = vadd.f32 %v1143_v37, %v3940_v30  ;;  %v2300_v39 = vpop.f32.mrb[13].mxu0 }
 0x473   : > { %v1146_v40 = vpop.f32.mrb[14].mxu0 }
 0x474   : > { %v2301_v41 = vpop.f32.mrb[15].mxu0  ;;  %v1149_v42 = vsel %vm988_vm2, %v1144_v38, -inf }
 0x475   : > { %1150 = vmax.xlane.f32.xlu1 %v1149_v42 }
 0x486   : > { %1048 = vrot.lane.b32.xlu1 %v3920_v21, %s3262_s18 }
 0x48f   : > { %v1037_v43 = vpop.xlane.xlu1 %1036 }
 0x490   : > { %v1038_v44 = vsub.f32 %v1030_v32, %v1037_v43 }
 0x492   : > { %v1039_v45 = vmul.f32 1.442695, %v1038_v44 }
 0x494   : > { %2622 = vpow2.f32 %v1039_v45 }
 0x49e   : > { %v2623_v46 = vpop.eup %2622 }
 0x49f   : > { %v1041_v47 = vsel %vm988_vm2, %v2623_v46, 0.0 }
 0x4a0   : > { %1042 = vadd.xlane.f32.xlu0 %v1041_v47 }
 0x502   : > { %v1151_v48 = vpop.xlane.xlu1 %1150 }
 0x503   : > { %v1152_v49 = vsub.f32 %v1144_v38, %v1151_v48 }
 0x505   : > { %v1153_v50 = vmul.f32 1.442695, %v1152_v49 }
 0x506   : > { %v1049_v51 = vpop.permute.xlu1 %1048 }
 0x507   : > { %2624 = vpow2.f32 %v1153_v50  ;;  %v1055_v52 = vsel %vm1053_vm3, %v1049_v51, 0  ;;  %v986_v51 = vld [vmem:[#allocation14 + $0x8] sm:$0xf] }
 0x508   : > { %2291 = vmatpush3.bf16.msra.mxu1 %v1055_v52  ;;  %v1417_v52 = vsel %vm1053_vm3, %v986_v51, 0 }
 0x509   : > { %2302 = vmatprep.subr.bf16.mxu1 %v3259_v0 }
 0x511   : > { %v2625_v53 = vpop.eup %2624 }
 0x512   : > { %v1155_v54 = vsel %vm988_vm2, %v2625_v53, 0.0 }
 0x513   : > { %1156 = vadd.xlane.f32.xlu1 %v1155_v54 }
 0x524   : > { %1161 = vrot.lane.b32.xlu1 %v3920_v21, %s3263_s16 }
 0x528   : > { %1304 = vrot.lane.b32.xlu1 %v3920_v21, %s3264_s21 }
 0x52c   : > { %1302 = vrot.lane.b32.xlu1 %v3925_v24, %s3264_s21 }
 0x52d   : > { %v1043_v55 = vpop.xlane.xlu0 %1042 }
 0x52e   : > { %2626 = vrcp.f32 %v1043_v55 }
 0x538   : > { %v2627_v56 = vpop.eup %2626 }
 0x539   : > { %v1045_v57 = vmul.f32 %v2627_v56, %v2623_v46 }
 0x53b   : > { %v1046_v58 = vpack.c.bf16 %v1045_v57, %v1045_v57 }
 0x53d   : > { %2293 = vmatmul.mubr.msk.bf16.vlgmr.msra.gmra.mrb[0].mxu1 %vm988_vm2, %v1046_v58 }
 0x53e   : > { %2304 = vmatprep.mubr.msk.bf16.mxu1 %vm3260_vm0, %v3259_v0 }
 0x5a0   : > { %v1157_v61 = vpop.xlane.xlu1 %1156 }
 0x5a1   : > { %2628 = vrcp.f32 %v1157_v61 }
 0x5a4   : > { %v1162_v62 = vpop.permute.xlu1 %1161 }
 0x5a5   : > { %v1167_v63 = vsel %vm1053_vm3, %v1162_v62, 0 }
 0x5a6   : > { %2303 = vmatpush3.bf16.msra.mxu1 %v1167_v63 }
 0x5a7   : > { %2314 = vmatprep.subr.bf16.mxu1 %v3259_v0 }
 0x5a8   : > { %v1305_v12 = vpop.permute.xlu1 %1304 }
 0x5a9   : > { %v1310_v17 = vsel %vm988_vm2, %v1305_v12, 0 }
 0x5ab   : > { %v2629_v1 = vpop.eup %2628 }
 0x5ac   : > { %v1159_v4 = vmul.f32 %v2629_v1, %v2625_v53  ;;  %v1303_v19 = vpop.permute.xlu1 %1302 }
 0x5ae   : > { %v1160_v5 = vpack.c.bf16 %v1159_v4, %v1159_v4 }
 0x5b0   : > { %2305 = vmatmul.mubr.msk.bf16.vlgmr.msra.gmra.mrb[4].mxu1 %vm988_vm2, %v1160_v5 }
 0x5b1   : > { %2315 = vmatpush3.bf16.msra.mxu1 %v1260_v6  ;;  %2316 = vmatprep.mubr.msk.bf16.mxu1 %vm3260_vm0, %v3259_v0 }
 0x5b2   : > { %2326 = vmatprep.subr.bf16.mxu1 %v3259_v0 }
 0x610   : > { %v1091_v7 = vpop.f32.mrb[0].mxu1 }
 0x611   : > { %v1097_v8 = vpack.c.bf16 %v1091_v7, %v1091_v7  ;;  %v2294_v9 = vpop.f32.mrb[1].mxu1  ;;  %v987_v7 = vld [vmem:[#allocation14 + $0xc] sm:$0xf] }
 0x612   : > { %v1094_v10 = vpop.f32.mrb[2].mxu1 }
 0x613   : > { %v2295_v11 = vpop.f32.mrb[3].mxu1  ;;  %2317 = vmatmul.mubr.msk.bf16.vlgmr.msra.gmra.mrb[8].mxu1 %vm988_vm2, %v1097_v8 }
 0x614   : > { %2328 = vmatprep.mubr.msk.bf16.mxu1 %vm3260_vm0, %v3259_v0 }
 0x683   : > { %v1203_v13 = vpop.f32.mrb[4].mxu1 }
 0x684   : > { %v1209_v14 = vpack.c.bf16 %v1203_v13, %v1203_v13  ;;  %v2306_v15 = vpop.f32.mrb[5].mxu1 }
 0x685   : > { %v1206_v16 = vpop.f32.mrb[6].mxu1 }
 0x686   : > { %v2307_v18 = vpop.f32.mrb[7].mxu1  ;;  %2311 = vmatmul.mubr.msk.bf16.vlgmr.msra.gmra.mrb[16].mxu0 %vm988_vm2, %v1209_v14 }
 0x687   : > { %2321 = vmatpush3.bf16.xpose.msra.mxu0 %v1310_v17  ;;  %2322 = vmatprep.mubr.msk.bf16.mxu0 %vm3260_vm0, %v3259_v0 }
 0x688   : > { %2332 = vmatprep.subr.bf16.mxu0 %v3259_v0 }
 0x68e   : > { %2323 = vmatmul.mubr.msk.bf16.vlgmr.msra.gmra.mrb[20].mxu0 %vm988_vm2, %v1303_v19 }
 0x68f   : > { %2334 = vmatprep.mubr.msk.bf16.mxu0 %vm3260_vm0, %v3259_v0  ;;  %2333 = vmatpush3.bf16.msra.mxu0 %v1417_v52  ;;  %v2206_v52 = vld [vmem:[#allocation19] ss:$0 sm:$0xff] }
 0x690   : > { %2344 = vmatprep.subr.bf16.mxu0 %v3259_v0 }
 0x6e6   : > { %v1296_v20 = vpop.f32.mrb[8].mxu1 }
 0x6e7   : > { %v2318_v22 = vpop.f32.mrb[9].mxu1 }
 0x6e8   : > { %v1299_v23 = vpop.f32.mrb[10].mxu1 }
 0x6e9   : > { %v2319_v25 = vpop.f32.mrb[11].mxu1 }
 0x759   : > { %v1250_v26 = vpop.f32.mrb[16].mxu0 }
 0x75a   : > { %v3977_v27 = vadd.f32 %v1296_v20, %v1250_v26  ;;  %v2312_v28 = vpop.f32.mrb[17].mxu0  ;;  %v2204_v26 = vld [vmem:[#allocation16] ss:$0 sm:$0xff] }
 0x75b   : > { %v1253_v29 = vpop.f32.mrb[18].mxu0 }
 0x75c   : > { %v2313_v31 = vpop.f32.mrb[19].mxu0 }
 0x761   : > { %v1346_v32 = vpop.f32.mrb[20].mxu0 }
 0x762   : > { %v1347_v33 = vadd.f32 %v1346_v32, %v3940_v30  ;;  %v2324_v34 = vpop.f32.mrb[21].mxu0 }
 0x763   : > { %v1349_v35 = vpop.f32.mrb[22].mxu0 }
 0x764   : > { %v2325_v36 = vpop.f32.mrb[23].mxu0  ;;  %v1352_v37 = vsel %vm988_vm2, %v1347_v33, -inf }
 0x765   : > { %1353 = vmax.xlane.f32.xlu0 %v1352_v37 }
 0x77b   : > { %1364 = vrot.lane.b32.xlu0 %v3920_v21, %s3265_s28 }
 0x77f   : > { %1462 = vrot.lane.b32.xlu0 %v3920_v21, %s3266_s12 }
 0x783   : > { %1460 = vrot.lane.b32.xlu0 %v3925_v24, %s3266_s12 }
 0x7f2   : > { %v1354_v38 = vpop.xlane.xlu0 %1353 }
 0x7f3   : > { %v1355_v39 = vsub.f32 %v1347_v33, %v1354_v38 }
 0x7f5   : > { %v1356_v40 = vmul.f32 1.442695, %v1355_v39 }
 0x7f6   : > { %v1365_v41 = vpop.permute.xlu0 %1364 }
 0x7f7   : > { %2630 = vpow2.f32 %v1356_v40  ;;  %v1370_v42 = vsel %vm1053_vm3, %v1365_v41, 0  ;;  %v2612_v40 = vld [vmem:[#allocation20] sm:$0xff]   ;;  %v2613_v41 = vld [vmem:[#allocation20 + $0x8] sm:$0xff]  }
 0x7f8   : > { %2327 = vmatpush3.bf16.msra.mxu1 %v1370_v42  ;;  %v2614_v42 = vld [vmem:[#allocation23] sm:$0xff]  }
 0x7f9   : > { %2338 = vmatprep.subr.bf16.mxu1 %v3259_v0 }
 0x7fa   : > { %v1463_v48 = vpop.permute.xlu0 %1462 }
 0x7fb   : > { %v1468_v49 = vsel %vm988_vm2, %v1463_v48, 0 }
 0x7fe   : > { %v1461_v50 = vpop.permute.xlu0 %1460 }
 0x801   : > { %v2631_v43 = vpop.eup %2630 }
 0x802   : > { %v1358_v44 = vsel %vm988_vm2, %v2631_v43, 0.0 }
 0x803   : > { %1359 = vadd.xlane.f32.xlu1 %v1358_v44  ;;  %v2617_v44 = vld [vmem:[#allocation23 + $0x18] sm:$0xff]  }
 0x890   : > { %v1360_v45 = vpop.xlane.xlu1 %1359 }
 0x891   : > { %2632 = vrcp.f32 %v1360_v45  ;;  %v2618_v45 = vld [vmem:[#allocation23 + $0x20] sm:$0xff]  }
 0x89b   : > { %v2633_v46 = vpop.eup %2632 }
 0x89c   : > { %v1362_v47 = vmul.f32 %v2633_v46, %v2631_v43  ;;  %v2615_v43 = vld [vmem:[#allocation23 + $0x8] sm:$0xff]  }
 0x89d   : > { %v2619_v46 = vld [vmem:[#allocation23 + $0x28] sm:$0xff]  }
 0x89e   : > { %v1363_v24 = vpack.c.bf16 %v1362_v47, %v1362_v47 }
 0x8a0   : > { %2329 = vmatmul.mubr.msk.bf16.vlgmr.msra.gmra.mrb[12].mxu1 %vm988_vm2, %v1363_v24 }
 0x8a1   : > { %2339 = vmatpush3.bf16.xpose.msra.mxu1 %v1468_v49  ;;  %2340 = vmatprep.mubr.msk.bf16.mxu1 %vm3260_vm0, %v3259_v0 }
 0x8a2   : > { %2350 = vmatprep.subr.bf16.mxu1 %v3259_v0 }
 0x8a8   : > { %2341 = vmatmul.mubr.msk.bf16.vlgmr.msra.gmra.mrb[16].mxu1 %vm988_vm2, %v1461_v50  ;;  %v2205_v50 = vld [vmem:[#allocation17] ss:$0 sm:$0xff] }
 0x8a9   : > { %2352 = vmatprep.mubr.msk.bf16.mxu1 %vm3260_vm0, %v3259_v0 }
 0x973   : > { %v1406_v53 = vpop.f32.mrb[12].mxu1 }
 0x974   : > { %v1412_v54 = vpack.c.bf16 %v1406_v53, %v1406_v53  ;;  %v2330_v55 = vpop.f32.mrb[13].mxu1 }
 0x975   : > { %v1409_v56 = vpop.f32.mrb[14].mxu1 }
 0x976   : > { %v2331_v57 = vpop.f32.mrb[15].mxu1  ;;  %2335 = vmatmul.mubr.msk.bf16.vlgmr.msra.gmra.mrb[24].mxu0 %vm988_vm2, %v1412_v54  ;;  %v2620_v56 = vld [vmem:[#allocation23 + $0x30] sm:$0xff]  }
 0x977   : > { %2346 = vmatprep.mubr.msk.bf16.mxu0 %vm3260_vm0, %v3259_v0  ;;  %v2621_v57 = vld [vmem:[#allocation23 + $0x38] sm:$0xff]  }
 0x97b   : > { %v1504_v58 = vpop.f32.mrb[16].mxu1 }
 0x97c   : > { %v1505_v59 = vadd.f32 %v1504_v58, %v3940_v30  ;;  %v2342_v60 = vpop.f32.mrb[17].mxu1  ;;  %v1575_v30 = vsel %vm1053_vm3, %v987_v7, 0  ;;  %v2207_v58 = vld [vmem:[#allocation22] ss:$0 sm:$0xff] }
 0x97d   : > { %v1507_v61 = vpop.f32.mrb[18].mxu1  ;;  %2351 = vmatpush3.bf16.msra.mxu1 %v1575_v30 }
 0x97e   : > { %v2343_v62 = vpop.f32.mrb[19].mxu1  ;;  %v1510_v63 = vsel %vm988_vm2, %v1505_v59, -inf  ;;  %2364 = vmatprep.subr.bf16.mxu1 %v3259_v0 }
 0x97f   : > { %1511 = vmax.xlane.f32.xlu0 %v1510_v63 }
 0xa0c   : > { %v1512_v1 = vpop.xlane.xlu0 %1511 }
 0xa0d   : > { %v1513_v2 = vsub.f32 %v1505_v59, %v1512_v1 }
 0xa0f   : > { %v1514_v4 = vmul.f32 1.442695, %v1513_v2 }
 0xa11   : > { %2634 = vpow2.f32 %v1514_v4  ;;  %v2211_v4 = vld [vmem:[#allocation25] ss:$0 sm:$0xff] }
 0xa1b   : > { %v2635_v5 = vpop.eup %2634 }
 0xa1c   : > { %v1516_v6 = vsel %vm988_vm2, %v2635_v5, 0.0 }
 0xa1d   : > { %1517 = vadd.xlane.f32.xlu1 %v1516_v6 }
 0xa2e   : > { %1522 = vrot.lane.b32.xlu1 %v3920_v21, %s3267_s27 }
 0xa49   : > { %v1453_v8 = vpop.f32.mrb[24].mxu0 }
 0xa4a   : > { %v1459_v9 = vadd.f32 %v1453_v8, %v3977_v27  ;;  %v2336_v10 = vpop.f32.mrb[25].mxu0 }
 0xa4b   : > { %v1456_v11 = vpop.f32.mrb[26].mxu0 }
 0xa4c   : > { %v2337_v12 = vpop.f32.mrb[27].mxu0 }
 0xaaa   : > { %v1518_v13 = vpop.xlane.xlu1 %1517 }
 0xaab   : > { %2636 = vrcp.f32 %v1518_v13 }
 0xaae   : > { %v1523_v14 = vpop.permute.xlu1 %1522 }
 0xaaf   : > { %v1528_v15 = vsel %vm1053_vm3, %v1523_v14, 0 }
 0xab0   : > { %2345 = vmatpush3.bf16.msra.mxu0 %v1528_v15 }
 0xab1   : > { %2356 = vmatprep.subr.bf16.mxu0 %v3259_v0 }
 0xab5   : > { %v2637_v21 = vpop.eup %2636 }
 0xab6   : > { %v1520_v16 = vmul.f32 %v2637_v21, %v2635_v5 }
 0xab8   : > { %v1521_v17 = vpack.c.bf16 %v1520_v16, %v1520_v16 }
 0xaba   : > { %2347 = vmatmul.mubr.msk.bf16.vlgmr.msra.gmra.mrb[28].mxu0 %vm988_vm2, %v1521_v17 }
 0xabb   : > { %2360 = vmatprep.mubr.msk.bf16.mxu0 %vm3260_vm0, %v3259_v0  ;;  %2357 = vmatpush3.bf16.msra.mxu0 %v2612_v40 }
 0xabc   : > { %2358 = vmatprep.subr.bf16.mxu0 %v3259_v0 }
 0xabf   : > { %2359 = vmatpush3.bf16.msra.mxu0 %v2613_v41 }
 0xb8d   : > { %v1564_v18 = vpop.f32.mrb[28].mxu0 }
 0xb8e   : > { %v1570_v19 = vpack.c.bf16 %v1564_v18, %v1564_v18  ;;  %v2348_v20 = vpop.f32.mrb[29].mxu0  ;;  %v2220_v18 = vld [vmem:[#allocation26] ss:$0 sm:$0xff] }
 0xb8f   : > { %v1567_v22 = vpop.f32.mrb[30].mxu0  ;;  %v2221_v20 = vld [vmem:[#allocation28] ss:$0 sm:$0xff] }
 0xb90   : > { %v2349_v23 = vpop.f32.mrb[31].mxu0  ;;  %2353 = vmatmul.mubr.msk.bf16.vlgmr.msra.gmra.mrb[20].mxu1 %vm988_vm2, %v1570_v19 }
 0xb91   : > { %2380 = vmatprep.mubr.msk.bf16.mxu1 %vm3260_vm0, %v3259_v0  ;;  %2365 = vmatpush3.bf16.msra.mxu1 %v2614_v42 }
 0xb92   : > { %2366 = vmatprep.subr.bf16.mxu1 %v3259_v0 }
 0xb95   : > { %2367 = vmatpush3.bf16.msra.mxu1 %v2615_v43 }
 0xb96   : > { %2368 = vmatprep.subr.bf16.mxu1 %v3259_v0 }
 0xc63   : > { %v1611_v25 = vpop.f32.mrb[20].mxu1 }
 0xc64   : > { %v1617_v27 = vadd.f32 %v1611_v25, %v1459_v9  ;;  %v2354_v28 = vpop.f32.mrb[21].mxu1 }
 0xc65   : > { %v1614_v29 = vpop.f32.mrb[22].mxu1 }
 0xc66   : > { %v1625_v31 = vadd.f32 %v2204_v26, %v1617_v27  ;;  %v2355_v32 = vpop.f32.mrb[23].mxu1 }
 0xc68   : > { %v1626_v33 = vadd.f32 %v1625_v31, %v3904_v3  ;;  %v2616_v3 = vld [vmem:[#allocation23 + $0x10] sm:$0xff]  }
 0xc69   : > { %2369 = vmatpush3.bf16.msra.mxu1 %v2616_v3 }
 0xc6a   : > { %v1629_v34 = vsel %vm871_vm1, %v1626_v33, 0.0  ;;  %2370 = vmatprep.subr.bf16.mxu1 %v3259_v0 }
 0xc6b   : > { %1630 = vadd.xlane.f32.xlu1 %v1629_v34 }
 0xc6d   : > { %2371 = vmatpush3.bf16.msra.mxu1 %v2617_v44 }
 0xc6e   : > { %2372 = vmatprep.subr.bf16.mxu1 %v3259_v0 }
 0xc71   : > { %2373 = vmatpush3.bf16.msra.mxu1 %v2618_v45 }
 0xc72   : > { %2374 = vmatprep.subr.bf16.mxu1 %v3259_v0 }
 0xc75   : > { %2375 = vmatpush3.bf16.msra.mxu1 %v2619_v46 }
 0xc76   : > { %2376 = vmatprep.subr.bf16.mxu1 %v3259_v0 }
 0xc79   : > { %2377 = vmatpush3.bf16.msra.mxu1 %v2620_v56 }
 0xc7a   : > { %2378 = vmatprep.subr.bf16.mxu1 %v3259_v0 }
 0xc7d   : > { %2379 = vmatpush3.bf16.msra.mxu1 %v2621_v57 }
 0xcf8   : > { %v1631_v35 = vpop.xlane.xlu1 %1630 }
 0xcf9   : > { %v1633_v36 = vmul.f32 0.03125, %v1631_v35 }
 0xcfb   : > { %v1634_v37 = vsub.f32 %v1626_v33, %v1633_v36 }
 0xcfd   : > { %v1635_v38 = vmul.f32 %v1634_v37, %v1634_v37 }
 0xcff   : > { %v1636_v39 = vsel %vm871_vm1, %v1635_v38, 0.0 }
 0xd00   : > { %1637 = vadd.xlane.f32.xlu0 %v1636_v39 }
 0xd8d   : > { %v1638_v47 = vpop.xlane.xlu0 %1637 }
 0xd8e   : > { %v1639_v48 = vmul.f32 0.03125, %v1638_v47 }
 0xd90   : > { %v1640_v24 = vadd.f32 1e-05, %v1639_v48 }
 0xd92   : > { %2638 = vrsqrt.f32 %v1640_v24 }
 0xd9c   : > { %v2639_v49 = vpop.eup %2638 }
 0xd9d   : > { %v1642_v51 = vmul.f32 %v2639_v49, %v1634_v37 }
 0xd9f   : > { %v1649_v53 = vmul.f32 %v2205_v50, %v1642_v51 }
 0xda1   : > { %v1656_v54 = vadd.f32 %v2206_v52, %v1649_v53 }
 0xda3   : > { %v1657_v55 = vpack.c.bf16 %v1656_v54, %v1656_v54 }
 0xda5   : > { %2361 = vmatmul.mubr.msk.bf16.vlgmr.msra.gmra.mrb[32].mxu0 %vm871_vm1, %v1657_v55 }
 0xe78   : > { %v1718_v59 = vpop.f32.mrb[32].mxu0 }
 0xe79   : > { %v1719_v60 = vadd.f32 %v2207_v58, %v1718_v59  ;;  %v2362_v61 = vpop.f32.mrb[33].mxu0 }
 0xe7a   : > { %v1721_v62 = vpop.f32.mrb[34].mxu0 }
 0xe7b   : > { %v1724_v63 = vmax.f32 %v1719_v60, 0.0  ;;  %v2363_v1 = vpop.f32.mrb[35].mxu0 }
 0xe7d   : > { %v1725_v2 = vpack.c.bf16 %v1724_v63, %v1724_v63 }
 0xe7f   : > { %2381 = vmatmul.mubr.bf16.vlgmr.msra.gmra.mrb[24].mxu1 %v1725_v2 }
 0xf52   : > { %v1831_v5 = vpop.f32.mrb[24].mxu1 }
 0xf53   : > { %v1832_v6 = vadd.f32 %v2211_v4, %v1831_v5  ;;  %v2382_v7 = vpop.f32.mrb[25].mxu1 }
 0xf54   : > { %v1834_v30 = vpop.f32.mrb[26].mxu1 }
 0xf55   : > { %v2383_v8 = vpop.f32.mrb[27].mxu1  ;;  %v1837_v9 = vadd.f32 %v1832_v6, %v1656_v54 }
 0xf57   : > { %v1840_v0 = vsel %vm871_vm1, %v1837_v9, 0.0 }
 0xf58   : > { %1841 = vadd.xlane.f32.xlu0 %v1840_v0 }
 0xfe5   : > { %v1842_v10 = vpop.xlane.xlu0 %1841 }
 0xfe6   : > { %v1843_v11 = vmul.f32 0.03125, %v1842_v10 }
 0xfe8   : > { %v1844_v12 = vsub.f32 %v1837_v9, %v1843_v11 }
 0xfea   : > { %v1845_v13 = vmul.f32 %v1844_v12, %v1844_v12 }
 0xfec   : > { %v1846_v14 = vsel %vm871_vm1, %v1845_v13, 0.0 }
 0xfed   : > { %1847 = vadd.xlane.f32.xlu0 %v1846_v14 }
0x107a   : > { %v1848_v15 = vpop.xlane.xlu0 %1847 }
0x107b   : > { %v1849_v21 = vmul.f32 0.03125, %v1848_v15 }
0x107d   : > { %v1850_v16 = vadd.f32 1e-05, %v1849_v21 }
0x107f   : > { %2640 = vrsqrt.f32 %v1850_v16 }
0x1089   : > { %v2641_v17 = vpop.eup %2640 }
0x108a   : > { %v1852_v19 = vmul.f32 %v2641_v17, %v1844_v12 }
0x108c   : > { %v1859_v22 = vmul.f32 %v2220_v18, %v1852_v19 }
0x108e   : > { %v1866_v23 = vadd.f32 %v2221_v20, %v1859_v22 }
0x1090   : > { %1867 = vst.msk [vmem:[%s839_s1] sm:$0xff] %vm871_vm1, %v1866_v23 }
0x1091   : > { %3137 = shalt.err (!%p3134_p2)
}
0x1092   : > { %s3138_s14 = scalar_lea.hbm %s4034_s9, 128  ;;  %s3142_s21 = scalar_lea.hbm %s4205_s7, 256 }
0x1093   : > { %p3139_p12 = scmp.ne.s32.totalorder %s4034_s9, %s3138_s14  ;;  %p3143_p10 = scmp.lt.u32.totalorder %s4034_s9, %s4205_s7 }
0x1094   : > { %p3144_p0 = scmp.lt.u32.totalorder %s3142_s21, %s3138_s14  ;;  %p3146_p8 = scmp.lt.u32.totalorder %s3138_s14, %s4034_s9 }
0x1095   : > { %p3140_p1 = pnand %p3139_p12, %p4206_p11 }
0x1096   : > { %p3145_p5 = por %p3144_p0, %p3143_p10 }
0x1097   : > { %p3141_p9 = pneg %p3140_p1 }
0x1098   : > { %p3147_p13 = por %p3146_p8, %p3145_p5 }
0x109a   : > { %p3148_p4 = pnand %p3147_p13, %p3141_p9 }
0x109c   : > { %3151 = shalt.err (!%p3148_p4)
}
0x109d   : > { %2446 = dma.vmem_to_hbm [thread:$0]  (%p4206_p11), %s4036_s11, 128, %s4034_s9, %s1869_s17  }
0x109e PF: > { %s1895_s27 = sand.u32 1, %s3218_s24   ;;  %p4207_p7 = scmp.ne.s32.totalorder %s4167_s19, 0 }
0x109f   : > { %p4208_p6 = scmp.ge.s32.totalorder %s3238_s29, 2  ;;  %s1896_s23 = scalar_lea.sflag [#allocation4], %s1895_s27 }
0x10a1   : > { %p2502_p3 = pnand %p4208_p6, %p4207_p7 }
0x10a3   : > { %3213 = dma.done.wait (!%p2502_p3), %s1896_s23, 128  }
0x10a4   : > { %3215 = vsyncadd (!%p2502_p3), %s1896_s23, 4294967168  ;;  %s43_s29 = sadd.s32 1, %s3238_s29   ;;  %s4209_s27 = sld [smem:[#allocation41_spill]] }
0x10a5   : > { %p40_p2 = scmp.ge.s32.totalorder %s43_s29, 4   ;;  %s4210_s28 = sld [smem:[#allocation43_spill]] }
0x10a6   : > { %s4211_s24 = smov %s3222_s25  ;;  %s4212_s25 = smov %s3226_s26 }
0x10a7   : > { %s4213_s26 = smov %s3601_s2  ;;  %42 = sbr.rel (!%p40_p2) target bundleno = 34 (0x22), region = 213 }
0x10ae   :  { %1901 = vsyncpa [#allocation3], 1 }
0x10af   :  { %1903 = vsyncpa [#allocation3 + $0x1], 1 }
0x10b0   :  { %1904 = vsyncpa [#allocation6], 1 }
0x10b1   :  { %1906 = vsyncpa [#allocation6 + $0x1], 1 }
0x10b2   :  { %1907 = vsyncpa [#allocation9], 1 }
0x10b3   :  { %1908 = vsyncpa [#allocation12], 1 }
0x10b4   :  { %1909 = vsyncpa [#allocation15], 1 }
0x10b5   :  { %1910 = vsyncpa [#allocation18], 1 }
0x10b6   :  { %1911 = vsyncpa [#allocation21], 1 }
0x10b7   :  { %1912 = vsyncpa [#allocation24], 1 }
0x10b8   :  { %1913 = vsyncpa [#allocation27], 1 }
0x10b9   :  { %1914 = vsyncpa [#allocation4], 1 }
0x10ba   :  { %1916 = vsyncpa [#allocation4 + $0x1], 1 }

</bundles_post_ra>
